<compile_context>
chip_gen: v7x
topology: tpu7x:2x2x1
jax: 0.10.0
libtpu: 0.0.40
codegen_flags: <defaults>
</compile_context>

<pallas_src>
import functools

import jax
import jax.numpy as jnp
from jax.experimental import pallas as pl
from jax.experimental.pallas import tpu as pltpu

NUM_HIDDEN = 128
NUM_INPUT = 12
NUM_LAYERS = 1
NUM_OUTPUT = 12

_SUBLANES = 8    # f32 sublane count
_LANES = 128     # vreg lane count


def hpwren_kernel(x2d_ref, w_ih_ref, w_hh_ref, b_ref, h0_ref, c0_ref,
                  w_fc_ref, b_fc_ref, out_ref, xg_ref, *, seq_len, batch_pad):
    """LSTM recurrence over `seq_len` steps + final Linear.

    x2d_ref:  (T*Bp, I)   time-major, batch-padded, flattened input (f32)
    w_ih_ref: (I, 4H)     input->gates, order [i, f, o, g], i/f/o cols * 0.5
    w_hh_ref: (H, 4H)     hidden->gates, order [i, f, o, g], i/f/o cols * 0.5, bf16
    b_ref:    (1, 4H)     bias_ih + bias_hh, same order/scaling (f32)
    h0_ref:   (Bp, H)     initial hidden state (batch-padded)
    c0_ref:   (Bp, H)     initial cell state (batch-padded)
    w_fc_ref: (H, 128)    fc weight (transposed, zero-padded to 128 lanes)
    b_fc_ref: (1, 128)    fc bias (zero-padded)
    out_ref:  (Bp, 128)   fc(h_last)  ==  fc(lstm_out)[:, -1, :] (padded)
    xg_ref:   (T*Bp, 4H)  VMEM scratch holding the hoisted input projection
    """
    H = NUM_HIDDEN
    Bp = batch_pad

    # Hoisted input projection (+ fused bias) for ALL timesteps: one matmul,
    # stored to VMEM scratch so it never occupies vregs across the unrolled
    # recurrence (keeping it live previously forced spill vst/vld traffic).
    xg_ref[...] = (jnp.dot(x2d_ref[...], w_ih_ref[...],
                           preferred_element_type=jnp.float32)
                   + b_ref[...])

    h = h0_ref[...]
    c = c0_ref[...]

    # TODO(synk): on toolchains where pltpu.matmul_push_rhs/acc_lhs/pop can
    # stage a (128, 512) bf16 RHS, push w_hh once before the loop and reuse it
    # every step to drop the per-step weight-push latency from the chain.
    for t in range(seq_len):
        # Per-step gate input: sublane-aligned VMEM read (only ~4 vregs live).
        # Recurrent matmul with bf16 operands (MXU-native), f32 accumulator;
        # w_hh is read from its ref inside the loop (not hoisted).
        gates = (xg_ref[pl.ds(t * Bp, Bp), :]
                 + jnp.dot(h.astype(jnp.bfloat16), w_hh_ref[...],
                           preferred_element_type=jnp.float32))   # (Bp, 4H)
        # Gate order is [i, f, o, g]; the i/f/o columns of W_ih, W_hh, b were
        # pre-scaled by 0.5 at param-prep time, so a single tanh pass over the
        # whole 4H slab yields every nonlinearity:
        #   sigmoid(x) = 0.5 * tanh(x / 2) + 0.5
        t_all = jnp.tanh(gates)                                   # one EUP slab
        sig = 0.5 * t_all[:, 0:3 * H] + 0.5
        i = sig[:, 0 * H:1 * H]
        f = sig[:, 1 * H:2 * H]
        o = sig[:, 2 * H:3 * H]
        g = t_all[:, 3 * H:4 * H]
        c = f * c + i * g
        h = o * jnp.tanh(c)

    # Final Linear on the last hidden state.  FC weight/bias are zero-padded to
    # a 128-lane output so the store is an unmasked, full-lane vst.
    out_ref[...] = (jnp.dot(h, w_fc_ref[...],
                            preferred_element_type=jnp.float32)
                    + b_fc_ref[...])


def prepare_kernel_params(params):
    """One-time conversion of nn.LSTM / nn.Linear parameters to kernel layout.

    - gate blocks permuted from PyTorch's [i, f, g, o] to [i, f, o, g]
    - i/f/o (sigmoid) columns of W_ih, W_hh, b pre-scaled by 0.5 so the kernel
      computes all four nonlinearities with one tanh slab
    - W_hh pre-cast to bfloat16 (MXU-native operand on the serial chain)
    - FC weight/bias zero-padded to a 128-lane output

    Call once at model-load time, NOT per inference step.
    """
    H, O = NUM_HIDDEN, NUM_OUTPUT
    perm = jnp.concatenate([
        jnp.arange(0 * H, 1 * H), jnp.arange(1 * H, 2 * H),
        jnp.arange(3 * H, 4 * H), jnp.arange(2 * H, 3 * H)])
    gate_scale = jnp.concatenate([
        jnp.full((3 * H,), 0.5, jnp.float32),   # i, f, o -> sigmoid via tanh
        jnp.ones((H,), jnp.float32)])           # g       -> plain tanh

    w_ih = params["weight_ih_l0"][perm].T.astype(jnp.float32) * gate_scale
    w_hh = params["weight_hh_l0"][perm].T.astype(jnp.float32) * gate_scale
    b = ((params["bias_ih_l0"] + params["bias_hh_l0"])[perm]
         .astype(jnp.float32) * gate_scale).reshape(1, -1)

    w_fc = jnp.zeros((H, _LANES), jnp.float32).at[:, :O].set(
        params["fc_weight"].T.astype(jnp.float32))
    b_fc = jnp.zeros((1, _LANES), jnp.float32).at[:, :O].set(
        params["fc_bias"].astype(jnp.float32))

    return {
        "w_ih": w_ih,                        # (I, 4H) f32
        "w_hh": w_hh.astype(jnp.bfloat16),   # (H, 4H) bf16
        "b": b,                              # (1, 4H) f32
        "w_fc": w_fc,                        # (H, 128) f32 (lane-padded)
        "b_fc": b_fc,                        # (1, 128) f32 (lane-padded)
    }


@jax.jit
def hpwren_forward(x, prev_state, kparams):
    """x: (B, T, NUM_INPUT) f32; prev_state: (h0, c0) each (1, B, NUM_HIDDEN)."""
    h0, c0 = prev_state
    B, T, I = x.shape
    assert I == NUM_INPUT
    H, O = NUM_HIDDEN, NUM_OUTPUT

    # Pad batch to the sublane width so vregs / state updates are dense.
    Bp = ((B + _SUBLANES - 1) // _SUBLANES) * _SUBLANES

    # Time-major, batch-padded, flattened to (T*Bp, I) so the kernel's hoisted
    # projection is a single matmul with no in-kernel reshape.
    x_tm = jnp.transpose(x, (1, 0, 2)).astype(jnp.float32)           # (T, B, I)
    x_tm = jnp.pad(x_tm, ((0, 0), (0, Bp - B), (0, 0)))              # (T, Bp, I)
    x2d = x_tm.reshape(T * Bp, I)

    h0p = jnp.pad(h0[0].astype(jnp.float32), ((0, Bp - B), (0, 0)))  # (Bp, H)
    c0p = jnp.pad(c0[0].astype(jnp.float32), ((0, Bp - B), (0, 0)))  # (Bp, H)

    vmem = pl.BlockSpec(memory_space=pltpu.MemorySpace.VMEM)
    kernel = functools.partial(hpwren_kernel, seq_len=T, batch_pad=Bp)
    out = pl.pallas_call(
        kernel,
        out_shape=jax.ShapeDtypeStruct((Bp, _LANES), jnp.float32),
        in_specs=[vmem] * 8,
        out_specs=vmem,
        scratch_shapes=[pltpu.VMEM((T * Bp, 4 * H), jnp.float32)],
    )(x2d, kparams["w_ih"], kparams["w_hh"], kparams["b"],
      h0p, c0p, kparams["w_fc"], kparams["b_fc"])
    return out[:B, :O]


def _reference_forward(x, prev_state, params):
    """Pure-JAX reference mirroring torch.nn.LSTM + Linear semantics (f32)."""
    h = prev_state[0][0]
    c = prev_state[1][0]
    H = NUM_HIDDEN
    w_ih = params["weight_ih_l0"]
    w_hh = params["weight_hh_l0"]
    b = params["bias_ih_l0"] + params["bias_hh_l0"]
    T = x.shape[1]
    for t in range(T):
        gates = x[:, t, :] @ w_ih.T + h @ w_hh.T + b
        i = jax.nn.sigmoid(gates[:, 0 * H:1 * H])
        f = jax.nn.sigmoid(gates[:, 1 * H:2 * H])
        g = jnp.tanh(gates[:, 2 * H:3 * H])
        o = jax.nn.sigmoid(gates[:, 3 * H:4 * H])
        c = f * c + i * g
        h = o * jnp.tanh(c)
    return h @ params["fc_weight"].T + params["fc_bias"]


def make_params(key):
    """Deterministic synthetic parameters with nn.LSTM / nn.Linear shapes."""
    H, I, O = NUM_HIDDEN, NUM_INPUT, NUM_OUTPUT
    ks = jax.random.split(key, 6)
    scale = 1.0 / jnp.sqrt(H)
    return {
        "weight_ih_l0": jax.random.uniform(ks[0], (4 * H, I), jnp.float32, -scale, scale),
        "weight_hh_l0": jax.random.uniform(ks[1], (4 * H, H), jnp.float32, -scale, scale),
        "bias_ih_l0":   jax.random.uniform(ks[2], (4 * H,),   jnp.float32, -scale, scale),
        "bias_hh_l0":   jax.random.uniform(ks[3], (4 * H,),   jnp.float32, -scale, scale),
        "fc_weight":    jax.random.uniform(ks[4], (O, H),     jnp.float32, -scale, scale),
        "fc_bias":      jax.random.uniform(ks[5], (O,),       jnp.float32, -scale, scale),
    }


if __name__ == "__main__":
    key = jax.random.PRNGKey(0)
    k_param, k_x, k_h, k_c = jax.random.split(key, 4)

    B, T = 2, 8
    params = make_params(k_param)
    x = jax.random.normal(k_x, (B, T, NUM_INPUT), jnp.float32)
    h0 = jax.random.normal(k_h, (NUM_LAYERS, B, NUM_HIDDEN), jnp.float32)
    c0 = jax.random.normal(k_c, (NUM_LAYERS, B, NUM_HIDDEN), jnp.float32)

    # One-time weight reformatting (kept out of the per-call hot path).
    kparams = prepare_kernel_params(params)

    out = hpwren_forward(x, (h0, c0), kparams)
    out = jax.block_until_ready(out)

    ref = _reference_forward(x, (h0, c0), params)
    assert out.shape == (B, NUM_OUTPUT)
    # Tolerance deliberately relaxed: the recurrent matmul uses bf16 operands
    # (f32 accumulation) per the MXU-native optimization.
    assert jnp.allclose(out, ref, atol=5e-2, rtol=5e-2), (
        float(jnp.max(jnp.abs(out - ref))))

    print("KERNEL_OK")
</pallas_src>

<mosaic_0001>
module attributes {stable_mosaic.version = 11 : i64} {
  func.func @hpwren_kernel(%arg0: memref<64x12xf32, #tpu.memory_space<vmem>>, %arg1: memref<12x512xf32, #tpu.memory_space<vmem>>, %arg2: memref<128x512xbf16, #tpu.memory_space<vmem>>, %arg3: memref<1x512xf32, #tpu.memory_space<vmem>>, %arg4: memref<8x128xf32, #tpu.memory_space<vmem>>, %arg5: memref<8x128xf32, #tpu.memory_space<vmem>>, %arg6: memref<128x128xf32, #tpu.memory_space<vmem>>, %arg7: memref<1x128xf32, #tpu.memory_space<vmem>>, %arg8: memref<8x128xf32, #tpu.memory_space<vmem>>, %arg9: memref<64x512xf32, #tpu.memory_space<vmem>>) attributes {dimension_semantics = [], scalar_prefetch = 0 : i64, scratch_operands = 1 : i64, tpu.core_type = #tpu.core_type<tc>} {
    %c0 = arith.constant 0 : index
    %c0_0 = arith.constant 0 : index
    %0 = vector.load %arg0[%c0, %c0_0] : memref<64x12xf32, #tpu.memory_space<vmem>>, vector<64x12xf32>
    %c0_1 = arith.constant 0 : index
    %c0_2 = arith.constant 0 : index
    %1 = vector.load %arg1[%c0_1, %c0_2] : memref<12x512xf32, #tpu.memory_space<vmem>>, vector<12x512xf32>
    %cst = arith.constant dense<0.000000e+00> : vector<64x512xf32>
    %2 = tpu.matmul %0, %1, %cst {dimension_numbers = #tpu.dot_dimension_numbers<[1], [0], [0], [1], [0, 0, 1, 1], [], []>} : vector<64x12xf32>, vector<12x512xf32>, vector<64x512xf32> -> vector<64x512xf32>
    %c0_3 = arith.constant 0 : index
    %c0_4 = arith.constant 0 : index
    %3 = vector.load %arg3[%c0_3, %c0_4] : memref<1x512xf32, #tpu.memory_space<vmem>>, vector<1x512xf32>
    %4 = vector.broadcast %3 : vector<1x512xf32> to vector<64x512xf32>
    %5 = arith.addf %2, %4 : vector<64x512xf32>
    %c0_5 = arith.constant 0 : index
    %c0_6 = arith.constant 0 : index
    %6 = vector.load %arg9[%c0_5, %c0_6] : memref<64x512xf32, #tpu.memory_space<vmem>>, vector<64x512xf32>
    tpu.vector_store %arg9[%c0_5, %c0_6], %5 {strides = array<i32>} : memref<64x512xf32, #tpu.memory_space<vmem>>, vector<64x512xf32>,
    %c0_7 = arith.constant 0 : index
    %c0_8 = arith.constant 0 : index
    %7 = vector.load %arg4[%c0_7, %c0_8] : memref<8x128xf32, #tpu.memory_space<vmem>>, vector<8x128xf32>
    %c0_9 = arith.constant 0 : index
    %c0_10 = arith.constant 0 : index
    %8 = vector.load %arg5[%c0_9, %c0_10] : memref<8x128xf32, #tpu.memory_space<vmem>>, vector<8x128xf32>
    %c0_11 = arith.constant 0 : index
    %c0_12 = arith.constant 0 : index
    %9 = vector.load %arg9[%c0_11, %c0_12] : memref<64x512xf32, #tpu.memory_space<vmem>>, vector<8x512xf32>
    %10 = arith.truncf %7 : vector<8x128xf32> to vector<8x128xbf16>
    %c0_13 = arith.constant 0 : index
    %c0_14 = arith.constant 0 : index
    %11 = vector.load %arg2[%c0_13, %c0_14] : memref<128x512xbf16, #tpu.memory_space<vmem>>, vector<128x512xbf16>
    %cst_15 = arith.constant dense<0.000000e+00> : vector<8x512xf32>
    %12 = tpu.matmul %10, %11, %cst_15 {dimension_numbers = #tpu.dot_dimension_numbers<[1], [0], [0], [1], [0, 0, 1, 1], [], []>} : vector<8x128xbf16>, vector<128x512xbf16>, vector<8x512xf32> -> vector<8x512xf32>
    %13 = arith.addf %9, %12 : vector<8x512xf32>
    %14 = math.tanh %13 : vector<8x512xf32>
    %15 = vector.extract_strided_slice %14 {offsets = [0, 0], sizes = [8, 384], strides = [1, 1]} : vector<8x512xf32> to vector<8x384xf32>
    %cst_16 = arith.constant 5.000000e-01 : f32
    %16 = vector.broadcast %cst_16 : f32 to vector<8x384xf32>
    %17 = arith.mulf %16, %15 : vector<8x384xf32>
    %cst_17 = arith.constant 5.000000e-01 : f32
    %18 = vector.broadcast %cst_17 : f32 to vector<8x384xf32>
    %19 = arith.addf %17, %18 : vector<8x384xf32>
    %20 = vector.extract_strided_slice %19 {offsets = [0, 0], sizes = [8, 128], strides = [1, 1]} : vector<8x384xf32> to vector<8x128xf32>
    %21 = vector.extract_strided_slice %19 {offsets = [0, 128], sizes = [8, 128], strides = [1, 1]} : vector<8x384xf32> to vector<8x128xf32>
    %22 = vector.extract_strided_slice %19 {offsets = [0, 256], sizes = [8, 128], strides = [1, 1]} : vector<8x384xf32> to vector<8x128xf32>
    %23 = vector.extract_strided_slice %14 {offsets = [0, 384], sizes = [8, 128], strides = [1, 1]} : vector<8x512xf32> to vector<8x128xf32>
    %24 = arith.mulf %21, %8 : vector<8x128xf32>
    %25 = arith.mulf %20, %23 : vector<8x128xf32>
    %26 = arith.addf %24, %25 : vector<8x128xf32>
    %27 = math.tanh %26 : vector<8x128xf32>
    %28 = arith.mulf %22, %27 : vector<8x128xf32>
    %c8 = arith.constant 8 : index
    %c0_18 = arith.constant 0 : index
    %29 = vector.load %arg9[%c8, %c0_18] : memref<64x512xf32, #tpu.memory_space<vmem>>, vector<8x512xf32>
    %30 = arith.truncf %28 : vector<8x128xf32> to vector<8x128xbf16>
    %c0_19 = arith.constant 0 : index
    %c0_20 = arith.constant 0 : index
    %31 = vector.load %arg2[%c0_19, %c0_20] : memref<128x512xbf16, #tpu.memory_space<vmem>>, vector<128x512xbf16>
    %cst_21 = arith.constant dense<0.000000e+00> : vector<8x512xf32>
    %32 = tpu.matmul %30, %31, %cst_21 {dimension_numbers = #tpu.dot_dimension_numbers<[1], [0], [0], [1], [0, 0, 1, 1], [], []>} : vector<8x128xbf16>, vector<128x512xbf16>, vector<8x512xf32> -> vector<8x512xf32>
    %33 = arith.addf %29, %32 : vector<8x512xf32>
    %34 = math.tanh %33 : vector<8x512xf32>
    %35 = vector.extract_strided_slice %34 {offsets = [0, 0], sizes = [8, 384], strides = [1, 1]} : vector<8x512xf32> to vector<8x384xf32>
    %cst_22 = arith.constant 5.000000e-01 : f32
    %36 = vector.broadcast %cst_22 : f32 to vector<8x384xf32>
    %37 = arith.mulf %36, %35 : vector<8x384xf32>
    %cst_23 = arith.constant 5.000000e-01 : f32
    %38 = vector.broadcast %cst_23 : f32 to vector<8x384xf32>
    %39 = arith.addf %37, %38 : vector<8x384xf32>
    %40 = vector.extract_strided_slice %39 {offsets = [0, 0], sizes = [8, 128], strides = [1, 1]} : vector<8x384xf32> to vector<8x128xf32>
    %41 = vector.extract_strided_slice %39 {offsets = [0, 128], sizes = [8, 128], strides = [1, 1]} : vector<8x384xf32> to vector<8x128xf32>
    %42 = vector.extract_strided_slice %39 {offsets = [0, 256], sizes = [8, 128], strides = [1, 1]} : vector<8x384xf32> to vector<8x128xf32>
    %43 = vector.extract_strided_slice %34 {offsets = [0, 384], sizes = [8, 128], strides = [1, 1]} : vector<8x512xf32> to vector<8x128xf32>
    %44 = arith.mulf %41, %26 : vector<8x128xf32>
    %45 = arith.mulf %40, %43 : vector<8x128xf32>
    %46 = arith.addf %44, %45 : vector<8x128xf32>
    %47 = math.tanh %46 : vector<8x128xf32>
    %48 = arith.mulf %42, %47 : vector<8x128xf32>
    %c16 = arith.constant 16 : index
    %c0_24 = arith.constant 0 : index
    %49 = vector.load %arg9[%c16, %c0_24] : memref<64x512xf32, #tpu.memory_space<vmem>>, vector<8x512xf32>
    %50 = arith.truncf %48 : vector<8x128xf32> to vector<8x128xbf16>
    %c0_25 = arith.constant 0 : index
    %c0_26 = arith.constant 0 : index
    %51 = vector.load %arg2[%c0_25, %c0_26] : memref<128x512xbf16, #tpu.memory_space<vmem>>, vector<128x512xbf16>
    %cst_27 = arith.constant dense<0.000000e+00> : vector<8x512xf32>
    %52 = tpu.matmul %50, %51, %cst_27 {dimension_numbers = #tpu.dot_dimension_numbers<[1], [0], [0], [1], [0, 0, 1, 1], [], []>} : vector<8x128xbf16>, vector<128x512xbf16>, vector<8x512xf32> -> vector<8x512xf32>
    %53 = arith.addf %49, %52 : vector<8x512xf32>
    %54 = math.tanh %53 : vector<8x512xf32>
    %55 = vector.extract_strided_slice %54 {offsets = [0, 0], sizes = [8, 384], strides = [1, 1]} : vector<8x512xf32> to vector<8x384xf32>
    %cst_28 = arith.constant 5.000000e-01 : f32
    %56 = vector.broadcast %cst_28 : f32 to vector<8x384xf32>
    %57 = arith.mulf %56, %55 : vector<8x384xf32>
    %cst_29 = arith.constant 5.000000e-01 : f32
    %58 = vector.broadcast %cst_29 : f32 to vector<8x384xf32>
    %59 = arith.addf %57, %58 : vector<8x384xf32>
    %60 = vector.extract_strided_slice %59 {offsets = [0, 0], sizes = [8, 128], strides = [1, 1]} : vector<8x384xf32> to vector<8x128xf32>
    %61 = vector.extract_strided_slice %59 {offsets = [0, 128], sizes = [8, 128], strides = [1, 1]} : vector<8x384xf32> to vector<8x128xf32>
    %62 = vector.extract_strided_slice %59 {offsets = [0, 256], sizes = [8, 128], strides = [1, 1]} : vector<8x384xf32> to vector<8x128xf32>
    %63 = vector.extract_strided_slice %54 {offsets = [0, 384], sizes = [8, 128], strides = [1, 1]} : vector<8x512xf32> to vector<8x128xf32>
    %64 = arith.mulf %61, %46 : vector<8x128xf32>
    %65 = arith.mulf %60, %63 : vector<8x128xf32>
    %66 = arith.addf %64, %65 : vector<8x128xf32>
    %67 = math.tanh %66 : vector<8x128xf32>
    %68 = arith.mulf %62, %67 : vector<8x128xf32>
    %c24 = arith.constant 24 : index
    %c0_30 = arith.constant 0 : index
    %69 = vector.load %arg9[%c24, %c0_30] : memref<64x512xf32, #tpu.memory_space<vmem>>, vector<8x512xf32>
    %70 = arith.truncf %68 : vector<8x128xf32> to vector<8x128xbf16>
    %c0_31 = arith.constant 0 : index
    %c0_32 = arith.constant 0 : index
    %71 = vector.load %arg2[%c0_31, %c0_32] : memref<128x512xbf16, #tpu.memory_space<vmem>>, vector<128x512xbf16>
    %cst_33 = arith.constant dense<0.000000e+00> : vector<8x512xf32>
    %72 = tpu.matmul %70, %71, %cst_33 {dimension_numbers = #tpu.dot_dimension_numbers<[1], [0], [0], [1], [0, 0, 1, 1], [], []>} : vector<8x128xbf16>, vector<128x512xbf16>, vector<8x512xf32> -> vector<8x512xf32>
    %73 = arith.addf %69, %72 : vector<8x512xf32>
    %74 = math.tanh %73 : vector<8x512xf32>
    %75 = vector.extract_strided_slice %74 {offsets = [0, 0], sizes = [8, 384], strides = [1, 1]} : vector<8x512xf32> to vector<8x384xf32>
    %cst_34 = arith.constant 5.000000e-01 : f32
    %76 = vector.broadcast %cst_34 : f32 to vector<8x384xf32>
    %77 = arith.mulf %76, %75 : vector<8x384xf32>
    %cst_35 = arith.constant 5.000000e-01 : f32
    %78 = vector.broadcast %cst_35 : f32 to vector<8x384xf32>
    %79 = arith.addf %77, %78 : vector<8x384xf32>
    %80 = vector.extract_strided_slice %79 {offsets = [0, 0], sizes = [8, 128], strides = [1, 1]} : vector<8x384xf32> to vector<8x128xf32>
    %81 = vector.extract_strided_slice %79 {offsets = [0, 128], sizes = [8, 128], strides = [1, 1]} : vector<8x384xf32> to vector<8x128xf32>
    %82 = vector.extract_strided_slice %79 {offsets = [0, 256], sizes = [8, 128], strides = [1, 1]} : vector<8x384xf32> to vector<8x128xf32>
    %83 = vector.extract_strided_slice %74 {offsets = [0, 384], sizes = [8, 128], strides = [1, 1]} : vector<8x512xf32> to vector<8x128xf32>
    %84 = arith.mulf %81, %66 : vector<8x128xf32>
    %85 = arith.mulf %80, %83 : vector<8x128xf32>
    %86 = arith.addf %84, %85 : vector<8x128xf32>
    %87 = math.tanh %86 : vector<8x128xf32>
    %88 = arith.mulf %82, %87 : vector<8x128xf32>
    %c32 = arith.constant 32 : index
    %c0_36 = arith.constant 0 : index
    %89 = vector.load %arg9[%c32, %c0_36] : memref<64x512xf32, #tpu.memory_space<vmem>>, vector<8x512xf32>
    %90 = arith.truncf %88 : vector<8x128xf32> to vector<8x128xbf16>
    %c0_37 = arith.constant 0 : index
    %c0_38 = arith.constant 0 : index
    %91 = vector.load %arg2[%c0_37, %c0_38] : memref<128x512xbf16, #tpu.memory_space<vmem>>, vector<128x512xbf16>
    %cst_39 = arith.constant dense<0.000000e+00> : vector<8x512xf32>
    %92 = tpu.matmul %90, %91, %cst_39 {dimension_numbers = #tpu.dot_dimension_numbers<[1], [0], [0], [1], [0, 0, 1, 1], [], []>} : vector<8x128xbf16>, vector<128x512xbf16>, vector<8x512xf32> -> vector<8x512xf32>
    %93 = arith.addf %89, %92 : vector<8x512xf32>
    %94 = math.tanh %93 : vector<8x512xf32>
    %95 = vector.extract_strided_slice %94 {offsets = [0, 0], sizes = [8, 384], strides = [1, 1]} : vector<8x512xf32> to vector<8x384xf32>
    %cst_40 = arith.constant 5.000000e-01 : f32
    %96 = vector.broadcast %cst_40 : f32 to vector<8x384xf32>
    %97 = arith.mulf %96, %95 : vector<8x384xf32>
    %cst_41 = arith.constant 5.000000e-01 : f32
    %98 = vector.broadcast %cst_41 : f32 to vector<8x384xf32>
    %99 = arith.addf %97, %98 : vector<8x384xf32>
    %100 = vector.extract_strided_slice %99 {offsets = [0, 0], sizes = [8, 128], strides = [1, 1]} : vector<8x384xf32> to vector<8x128xf32>
    %101 = vector.extract_strided_slice %99 {offsets = [0, 128], sizes = [8, 128], strides = [1, 1]} : vector<8x384xf32> to vector<8x128xf32>
    %102 = vector.extract_strided_slice %99 {offsets = [0, 256], sizes = [8, 128], strides = [1, 1]} : vector<8x384xf32> to vector<8x128xf32>
    %103 = vector.extract_strided_slice %94 {offsets = [0, 384], sizes = [8, 128], strides = [1, 1]} : vector<8x512xf32> to vector<8x128xf32>
    %104 = arith.mulf %101, %86 : vector<8x128xf32>
    %105 = arith.mulf %100, %103 : vector<8x128xf32>
    %106 = arith.addf %104, %105 : vector<8x128xf32>
    %107 = math.tanh %106 : vector<8x128xf32>
    %108 = arith.mulf %102, %107 : vector<8x128xf32>
    %c40 = arith.constant 40 : index
    %c0_42 = arith.constant 0 : index
    %109 = vector.load %arg9[%c40, %c0_42] : memref<64x512xf32, #tpu.memory_space<vmem>>, vector<8x512xf32>
    %110 = arith.truncf %108 : vector<8x128xf32> to vector<8x128xbf16>
    %c0_43 = arith.constant 0 : index
    %c0_44 = arith.constant 0 : index
    %111 = vector.load %arg2[%c0_43, %c0_44] : memref<128x512xbf16, #tpu.memory_space<vmem>>, vector<128x512xbf16>
    %cst_45 = arith.constant dense<0.000000e+00> : vector<8x512xf32>
    %112 = tpu.matmul %110, %111, %cst_45 {dimension_numbers = #tpu.dot_dimension_numbers<[1], [0], [0], [1], [0, 0, 1, 1], [], []>} : vector<8x128xbf16>, vector<128x512xbf16>, vector<8x512xf32> -> vector<8x512xf32>
    %113 = arith.addf %109, %112 : vector<8x512xf32>
    %114 = math.tanh %113 : vector<8x512xf32>
    %115 = vector.extract_strided_slice %114 {offsets = [0, 0], sizes = [8, 384], strides = [1, 1]} : vector<8x512xf32> to vector<8x384xf32>
    %cst_46 = arith.constant 5.000000e-01 : f32
    %116 = vector.broadcast %cst_46 : f32 to vector<8x384xf32>
    %117 = arith.mulf %116, %115 : vector<8x384xf32>
    %cst_47 = arith.constant 5.000000e-01 : f32
    %118 = vector.broadcast %cst_47 : f32 to vector<8x384xf32>
    %119 = arith.addf %117, %118 : vector<8x384xf32>
    %120 = vector.extract_strided_slice %119 {offsets = [0, 0], sizes = [8, 128], strides = [1, 1]} : vector<8x384xf32> to vector<8x128xf32>
    %121 = vector.extract_strided_slice %119 {offsets = [0, 128], sizes = [8, 128], strides = [1, 1]} : vector<8x384xf32> to vector<8x128xf32>
    %122 = vector.extract_strided_slice %119 {offsets = [0, 256], sizes = [8, 128], strides = [1, 1]} : vector<8x384xf32> to vector<8x128xf32>
    %123 = vector.extract_strided_slice %114 {offsets = [0, 384], sizes = [8, 128], strides = [1, 1]} : vector<8x512xf32> to vector<8x128xf32>
    %124 = arith.mulf %121, %106 : vector<8x128xf32>
    %125 = arith.mulf %120, %123 : vector<8x128xf32>
    %126 = arith.addf %124, %125 : vector<8x128xf32>
    %127 = math.tanh %126 : vector<8x128xf32>
    %128 = arith.mulf %122, %127 : vector<8x128xf32>
    %c48 = arith.constant 48 : index
    %c0_48 = arith.constant 0 : index
    %129 = vector.load %arg9[%c48, %c0_48] : memref<64x512xf32, #tpu.memory_space<vmem>>, vector<8x512xf32>
    %130 = arith.truncf %128 : vector<8x128xf32> to vector<8x128xbf16>
    %c0_49 = arith.constant 0 : index
    %c0_50 = arith.constant 0 : index
    %131 = vector.load %arg2[%c0_49, %c0_50] : memref<128x512xbf16, #tpu.memory_space<vmem>>, vector<128x512xbf16>
    %cst_51 = arith.constant dense<0.000000e+00> : vector<8x512xf32>
    %132 = tpu.matmul %130, %131, %cst_51 {dimension_numbers = #tpu.dot_dimension_numbers<[1], [0], [0], [1], [0, 0, 1, 1], [], []>} : vector<8x128xbf16>, vector<128x512xbf16>, vector<8x512xf32> -> vector<8x512xf32>
    %133 = arith.addf %129, %132 : vector<8x512xf32>
    %134 = math.tanh %133 : vector<8x512xf32>
    %135 = vector.extract_strided_slice %134 {offsets = [0, 0], sizes = [8, 384], strides = [1, 1]} : vector<8x512xf32> to vector<8x384xf32>
    %cst_52 = arith.constant 5.000000e-01 : f32
    %136 = vector.broadcast %cst_52 : f32 to vector<8x384xf32>
    %137 = arith.mulf %136, %135 : vector<8x384xf32>
    %cst_53 = arith.constant 5.000000e-01 : f32
    %138 = vector.broadcast %cst_53 : f32 to vector<8x384xf32>
    %139 = arith.addf %137, %138 : vector<8x384xf32>
    %140 = vector.extract_strided_slice %139 {offsets = [0, 0], sizes = [8, 128], strides = [1, 1]} : vector<8x384xf32> to vector<8x128xf32>
    %141 = vector.extract_strided_slice %139 {offsets = [0, 128], sizes = [8, 128], strides = [1, 1]} : vector<8x384xf32> to vector<8x128xf32>
    %142 = vector.extract_strided_slice %139 {offsets = [0, 256], sizes = [8, 128], strides = [1, 1]} : vector<8x384xf32> to vector<8x128xf32>
    %143 = vector.extract_strided_slice %134 {offsets = [0, 384], sizes = [8, 128], strides = [1, 1]} : vector<8x512xf32> to vector<8x128xf32>
    %144 = arith.mulf %141, %126 : vector<8x128xf32>
    %145 = arith.mulf %140, %143 : vector<8x128xf32>
    %146 = arith.addf %144, %145 : vector<8x128xf32>
    %147 = math.tanh %146 : vector<8x128xf32>
    %148 = arith.mulf %142, %147 : vector<8x128xf32>
    %c56 = arith.constant 56 : index
    %c0_54 = arith.constant 0 : index
    %149 = vector.load %arg9[%c56, %c0_54] : memref<64x512xf32, #tpu.memory_space<vmem>>, vector<8x512xf32>
    %150 = arith.truncf %148 : vector<8x128xf32> to vector<8x128xbf16>
    %c0_55 = arith.constant 0 : index
    %c0_56 = arith.constant 0 : index
    %151 = vector.load %arg2[%c0_55, %c0_56] : memref<128x512xbf16, #tpu.memory_space<vmem>>, vector<128x512xbf16>
    %cst_57 = arith.constant dense<0.000000e+00> : vector<8x512xf32>
    %152 = tpu.matmul %150, %151, %cst_57 {dimension_numbers = #tpu.dot_dimension_numbers<[1], [0], [0], [1], [0, 0, 1, 1], [], []>} : vector<8x128xbf16>, vector<128x512xbf16>, vector<8x512xf32> -> vector<8x512xf32>
    %153 = arith.addf %149, %152 : vector<8x512xf32>
    %154 = math.tanh %153 : vector<8x512xf32>
    %155 = vector.extract_strided_slice %154 {offsets = [0, 0], sizes = [8, 384], strides = [1, 1]} : vector<8x512xf32> to vector<8x384xf32>
    %cst_58 = arith.constant 5.000000e-01 : f32
    %156 = vector.broadcast %cst_58 : f32 to vector<8x384xf32>
    %157 = arith.mulf %156, %155 : vector<8x384xf32>
    %cst_59 = arith.constant 5.000000e-01 : f32
    %158 = vector.broadcast %cst_59 : f32 to vector<8x384xf32>
    %159 = arith.addf %157, %158 : vector<8x384xf32>
    %160 = vector.extract_strided_slice %159 {offsets = [0, 0], sizes = [8, 128], strides = [1, 1]} : vector<8x384xf32> to vector<8x128xf32>
    %161 = vector.extract_strided_slice %159 {offsets = [0, 128], sizes = [8, 128], strides = [1, 1]} : vector<8x384xf32> to vector<8x128xf32>
    %162 = vector.extract_strided_slice %159 {offsets = [0, 256], sizes = [8, 128], strides = [1, 1]} : vector<8x384xf32> to vector<8x128xf32>
    %163 = vector.extract_strided_slice %154 {offsets = [0, 384], sizes = [8, 128], strides = [1, 1]} : vector<8x512xf32> to vector<8x128xf32>
    %164 = arith.mulf %161, %146 : vector<8x128xf32>
    %165 = arith.mulf %160, %163 : vector<8x128xf32>
    %166 = arith.addf %164, %165 : vector<8x128xf32>
    %167 = math.tanh %166 : vector<8x128xf32>
    %168 = arith.mulf %162, %167 : vector<8x128xf32>
    %c0_60 = arith.constant 0 : index
    %c0_61 = arith.constant 0 : index
    %169 = vector.load %arg6[%c0_60, %c0_61] : memref<128x128xf32, #tpu.memory_space<vmem>>, vector<128x128xf32>
    %cst_62 = arith.constant dense<0.000000e+00> : vector<8x128xf32>
    %170 = tpu.matmul %168, %169, %cst_62 {dimension_numbers = #tpu.dot_dimension_numbers<[1], [0], [0], [1], [0, 0, 1, 1], [], []>} : vector<8x128xf32>, vector<128x128xf32>, vector<8x128xf32> -> vector<8x128xf32>
    %c0_63 = arith.constant 0 : index
    %c0_64 = arith.constant 0 : index
    %171 = vector.load %arg7[%c0_63, %c0_64] : memref<1x128xf32, #tpu.memory_space<vmem>>, vector<1x128xf32>
    %172 = vector.broadcast %171 : vector<1x128xf32> to vector<8x128xf32>
    %173 = arith.addf %170, %172 : vector<8x128xf32>
    %c0_65 = arith.constant 0 : index
    %c0_66 = arith.constant 0 : index
    %174 = vector.load %arg8[%c0_65, %c0_66] : memref<8x128xf32, #tpu.memory_space<vmem>>, vector<8x128xf32>
    tpu.vector_store %arg8[%c0_65, %c0_66], %173 {strides = array<i32>} : memref<8x128xf32, #tpu.memory_space<vmem>>, vector<8x128xf32>,
    return
  }
}

</mosaic_0001>

<bundles_post_ra>
// kernel: hpwren_forward.1
= control target key start
LH: loop header
LB: loop body
LE: loop exit
PB: predicated region body
PF: predicated region fallthrough
CT: control target
= control target key end

     0   :  { %13 = vsyncpa [#allocation4], 0  ;;  %s2585_s0 = inlined_call_operand.vmem [shape: f32[64,12], index: 0, kind: input, shape index: {}]   ;;  %s2586_s1 = inlined_call_operand.hbm [shape: f32[12,512], index: 1, kind: input, shape index: {}]   ;;  %s2587_s2 = inlined_call_operand.hbm [shape: bf16[128,512], index: 2, kind: input, shape index: {}]   ;;  %s2588_s3 = inlined_call_operand.vmem [shape: f32[1,512], index: 3, kind: input, shape index: {}]   ;;  %s2589_s4 = inlined_call_operand.vmem [shape: f32[8,128], index: 4, kind: input, shape index: {}]   ;;  %s2590_s5 = inlined_call_operand.vmem [shape: f32[8,128], index: 5, kind: input, shape index: {}]   ;;  %s2591_s6 = inlined_call_operand.vmem [shape: f32[128,128], index: 6, kind: input, shape index: {}]   ;;  %s2592_s7 = inlined_call_operand.vmem [shape: f32[1,128], index: 7, kind: input, shape index: {}]   ;;  %s2593_s8 = inlined_call_operand.vmem [shape: f32[8,128], index: 8, kind: output, shape index: {}]  }
   0x1   :  { %14 = vsyncpa [#allocation6], 0  ;;  %s1894_s27 = smov [#allocation3]   ;;  %s1846_s9 = scalar_lea.hbm %s2586_s1, 1024 }
   0x2   :  { %s22_s28 = sshll.u32 %s1894_s27, 4  ;;  %p1847_p0 = scmp.ne.s32.totalorder %s2586_s1, %s1846_s9  ;;  %s23_s28 = int_to_ptr.vmem [resolvable:$true] %s22_s28 }
   0x3   :  { %p1850_p1 = scmp.lt.u32.totalorder %s1846_s9, %s2586_s1 }
   0x5   :  { %p1852_p2 = pnand %p1850_p1, %p1847_p0 }
   0x7   :  { %1855 = shalt.err (!%p1852_p2)
}
   0x8   :  { %s1856_s14 = scalar_lea.vmem %s23_s28, 1024  ;;  %p1861_p4 = scmp.lt.s32.totalorder %s23_s28, %s23_s28 }
   0x9   :  { %p1857_p3 = scmp.ne.s32.totalorder %s23_s28, %s1856_s14  ;;  %p1862_p5 = scmp.lt.s32.totalorder %s1856_s14, %s1856_s14 }
   0xb   :  { %p1863_p6 = por %p1862_p5, %p1861_p4 }
   0xd   :  { %p1864_p7 = pnand %p1863_p6, %p1857_p3 }
   0xf   :  { %1867 = shalt.err (!%p1864_p7)
}
  0x10   :  { %s1895_s15 = smov 512   ;;  %s1896_s16 = smov 32  }
  0x11   :  { %28 = dma.hbm_to_vmem [thread:$0]  %s2586_s1, 1024, %s23_s28, [#allocation4], %s1895_s15, %s1895_s15, %s1896_s16  }
  0x12   :  { %s1897_s19 = smov [#allocation5]   ;;  %s1868_s23 = scalar_lea.hbm %s2587_s2, 4096 }
  0x13   :  { %s34_s20 = sshll.u32 %s1897_s19, 4  ;;  %p1869_p8 = scmp.ne.s32.totalorder %s2587_s2, %s1868_s23  ;;  %s35_s20 = int_to_ptr.vmem [resolvable:$true] %s34_s20 }
  0x14   :  { %p1872_p9 = scmp.lt.u32.totalorder %s1868_s23, %s2587_s2 }
  0x16   :  { %p1874_p10 = pnand %p1872_p9, %p1869_p8 }
  0x18   :  { %1877 = shalt.err (!%p1874_p10)
}
  0x19   :  { %s1878_s29 = scalar_lea.vmem %s35_s20, 4096  ;;  %p1883_p12 = scmp.lt.s32.totalorder %s35_s20, %s35_s20 }
  0x1a   :  { %p1879_p11 = scmp.ne.s32.totalorder %s35_s20, %s1878_s29  ;;  %p1884_p13 = scmp.lt.s32.totalorder %s1878_s29, %s1878_s29 }
  0x1c   :  { %p1885_p0 = por %p1884_p13, %p1883_p12 }
  0x1e   :  { %p1886_p1 = pnand %p1885_p0, %p1879_p11 }
  0x20   :  { %1889 = shalt.err (!%p1886_p1)
}
  0x21   :  { %s1898_s1 = smov 256   ;;  %s1899_s28 = smov 16  }
  0x22   :  { %40 = dma.hbm_to_vmem [thread:$0]  %s2587_s2, 4096, %s35_s20, [#allocation6], %s1898_s1, %s1898_s1, %s1899_s28  }
  0x23   :  { %1890 = dma.done.wait [#allocation4], 1024  }
  0x24   :  { %1891 = vsyncadd [#allocation4], 4294966272 }
  0x25   :  { %1892 = dma.done.wait [#allocation6], 4096  }
  0x26   :  { %1893 = vsyncadd [#allocation6], 4294963200  ;;  %v2594_v0 = vmov 0.0   ;;  %vm121_vm0 = vcmask 1043456   ;;  %vm1901_vm1 = vmmov 1   ;;  %v67_v2 = vld [vmem:[#allocation3 + $0x8] sm:$0xff]  ;;  %v76_v57 = vlaneseq }
  0x27   :  { %198 = vmatprep.mubr.f32.mxu0 %v2594_v0  ;;  %311 = vmatprep.mubr.f32.mxu1 %v2594_v0  ;;  %vm1976_vm2 = vmpackc.low %vm121_vm0, %vm1901_vm1  ;;  %v71_v3 = vld [vmem:[#allocation3 + $0x28] sm:$0xf]  ;;  %v69_v4 = vld [vmem:[#allocation3 + $0x18] sm:$0xff]  ;;  %vm96_vm3 = vcmask 97280   ;;  %v2595_v56 = vmov 0   ;;  %vm1904_vm4 = vmmov 0  }
  0x28   :  { %v1639_v5 = vpack.c.bf16 %v71_v3, %v67_v2  ;;  %v73_v6 = vld [vmem:[#allocation3 + $0x38] sm:$0xf]  ;;  %v66_v7 = vld [vmem:[#allocation3] sm:$0xff]  ;;  %v68_v11 = vld [vmem:[#allocation3 + $0x10] sm:$0xff]  ;;  %v77_v58 = vshrl.u32 %v76_v57, 7 }
  0x29   :  { %v70_v8 = vld [vmem:[#allocation3 + $0x20] sm:$0xf]  ;;  %v1645_v9 = vpack.c.bf16 %v73_v6, %v69_v4  ;;  %v72_v12 = vld [vmem:[#allocation3 + $0x30] sm:$0xf]  ;;  %v1985_v15 = vld [vmem:[#allocation5 + $0x4] ss:$16 sps:$4 sm:$0xff]  }
  0x2a   :  { %v1642_v10 = vpack.c.bf16 %v70_v8, %v66_v7  ;;  %v58_v13 = vld [vmem:[%s2585_s0] sm:$0xff]  ;;  %1641 = vmatprep.subr.msk.bf16.mxu0 %vm1976_vm2, %v1639_v5  ;;  %v1648_v14 = vpack.c.bf16 %v72_v12, %v68_v11  ;;  %v1991_v16 = vld [vmem:[#allocation5 + $0xc] ss:$16 sps:$4 sm:$0xff]   ;;  %v1998_v18 = vld [vmem:[#allocation5 + $0x8] ss:$16 sps:$4 sm:$0xff]   ;;  %v78_v59 = vsub.s32 0, %v77_v58 }
  0x2b   :  { %1647 = vmatprep.subr.msk.bf16.mxu1 %vm1976_vm2, %v1645_v9  ;;  %v1996_v17 = vld [vmem:[#allocation5] ss:$16 sps:$4 sm:$0xff]   ;;  %v2001_v19 = vld [vmem:[#allocation5 + $0x24] ss:$16 sps:$4 sm:$0xff]   ;;  %v2004_v20 = vld [vmem:[#allocation5 + $0x2c] ss:$16 sps:$4 sm:$0xff]  }
  0x2c   :  { %1644 = vmatpush1.bf16.msk.msra.mxu0 %vm1976_vm2, %v1642_v10  ;;  %1650 = vmatpush1.bf16.msk.msra.mxu1 %vm1976_vm2, %v1648_v14  ;;  %v59_v21 = vld [vmem:[%s2585_s0 + $0x8] sm:$0xff]  ;;  %v2011_v22 = vld [vmem:[#allocation5 + $0x20] ss:$16 sps:$4 sm:$0xff]   ;;  %v2019_v24 = vld [vmem:[#allocation5 + $0x44] ss:$16 sps:$4 sm:$0xff]   ;;  %v82_v62 = vsub.s32 1, %v77_v58 }
  0x2d   :  { %591 = vmatprep.subr.bf16.mxu0 %v1985_v15  ;;  %632 = vmatprep.subr.bf16.mxu1 %v1991_v16  ;;  %v2015_v23 = vld [vmem:[#allocation5 + $0x28] ss:$16 sps:$4 sm:$0xff]   ;;  %v60_v25 = vld [vmem:[%s2585_s0 + $0x10] sm:$0xff]  ;;  %v2026_v26 = vld [vmem:[#allocation5 + $0x4c] ss:$16 sps:$4 sm:$0xff]   ;;  %v86_v63 = vsub.s32 2, %v77_v58 }
  0x2e   :  { %v2030_v27 = vld [vmem:[#allocation5 + $0x40] ss:$16 sps:$4 sm:$0xff]   ;;  %v2034_v28 = vld [vmem:[#allocation5 + $0x48] ss:$16 sps:$4 sm:$0xff]   ;;  %v2041_v30 = vld [vmem:[#allocation5 + $0x64] ss:$16 sps:$4 sm:$0xff]  }
  0x2f   :  { %1536 = vmatmul.mubr.msk.f32.vlgmr.msra.gmra.mrb[0].mxu0 %vm96_vm3, %v58_v13  ;;  %1546 = vmatmul.mubr.msk.f32.vlgmr.msra.gmra.mrb[0].mxu1 %vm96_vm3, %v58_v13  ;;  %v61_v29 = vld [vmem:[%s2585_s0 + $0x18] sm:$0xff]  ;;  %v2049_v32 = vld [vmem:[#allocation5 + $0x60] ss:$16 sps:$4 sm:$0xff]   ;;  %v2057_v34 = vld [vmem:[#allocation5 + $0x84] ss:$16 sps:$4 sm:$0xff]   ;;  %v90_v3 = vsub.s32 3, %v77_v58 }
  0x30   :  { %592 = vmatpush1.bf16.msra.mxu0 %v1996_v17  ;;  %633 = vmatpush1.bf16.msra.mxu1 %v1998_v18  ;;  %v2045_v31 = vld [vmem:[#allocation5 + $0x6c] ss:$16 sps:$4 sm:$0xff]   ;;  %v2053_v33 = vld [vmem:[#allocation5 + $0x68] ss:$16 sps:$4 sm:$0xff]   ;;  %v62_v36 = vld [vmem:[%s2585_s0 + $0x20] sm:$0xff] }
  0x31   :  { %204 = vmatprep.mubr.f32.mxu0 %v2594_v0  ;;  %317 = vmatprep.mubr.f32.mxu1 %v2594_v0  ;;  %v2061_v35 = vld [vmem:[#allocation5 + $0x8c] ss:$16 sps:$4 sm:$0xff]   ;;  %v2068_v37 = vld [vmem:[#allocation5 + $0x80] ss:$16 sps:$4 sm:$0xff]   ;;  %v2072_v38 = vld [vmem:[#allocation5 + $0x88] ss:$16 sps:$4 sm:$0xff]  }
  0x32   :  { %593 = vmatprep.subr.bf16.mxu0 %v2001_v19  ;;  %634 = vmatprep.subr.bf16.mxu1 %v2004_v20  ;;  %v2076_v39 = vld [vmem:[#allocation5 + $0xa4] ss:$16 sps:$4 sm:$0xff]   ;;  %v63_v40 = vld [vmem:[%s2585_s0 + $0x28] sm:$0xff]  ;;  %v2087_v42 = vld [vmem:[#allocation5 + $0xa0] ss:$16 sps:$4 sm:$0xff]  }
  0x33   :  { %1537 = vmatmul.mubr.msk.f32.gmra.mrb[2].mxu0 %vm96_vm3, %v59_v21  ;;  %1547 = vmatmul.mubr.msk.f32.gmra.mrb[2].mxu1 %vm96_vm3, %v59_v21  ;;  %v2083_v41 = vld [vmem:[#allocation5 + $0xac] ss:$16 sps:$4 sm:$0xff]   ;;  %v2091_v43 = vld [vmem:[#allocation5 + $0xa8] ss:$16 sps:$4 sm:$0xff]   ;;  %v2095_v44 = vld [vmem:[#allocation5 + $0xc4] ss:$16 sps:$4 sm:$0xff]  }
  0x34   :  { %594 = vmatpush1.bf16.msra.mxu0 %v2011_v22  ;;  %635 = vmatpush1.bf16.msra.mxu1 %v2015_v23  ;;  %v2099_v45 = vld [vmem:[#allocation5 + $0xcc] ss:$16 sps:$4 sm:$0xff]   ;;  %v64_v46 = vld [vmem:[%s2585_s0 + $0x30] sm:$0xff]  ;;  %v2110_v48 = vld [vmem:[#allocation5 + $0xc8] ss:$16 sps:$4 sm:$0xff]  }
  0x35   :  { %210 = vmatprep.mubr.f32.mxu0 %v2594_v0  ;;  %323 = vmatprep.mubr.f32.mxu1 %v2594_v0  ;;  %v2106_v47 = vld [vmem:[#allocation5 + $0xc0] ss:$16 sps:$4 sm:$0xff]   ;;  %v2114_v49 = vld [vmem:[#allocation5 + $0xe4] ss:$16 sps:$4 sm:$0xff]   ;;  %v2118_v50 = vld [vmem:[#allocation5 + $0xec] ss:$16 sps:$4 sm:$0xff]  }
  0x36   :  { %595 = vmatprep.subr.bf16.mxu0 %v2019_v24  ;;  %636 = vmatprep.subr.bf16.mxu1 %v2026_v26  ;;  %v65_v51 = vld [vmem:[%s2585_s0 + $0x38] sm:$0xff]  ;;  %v2125_v52 = vld [vmem:[#allocation5 + $0xe0] ss:$16 sps:$4 sm:$0xff]  }
  0x37   :  { %1538 = vmatmul.mubr.msk.f32.gmra.mrb[4].mxu0 %vm96_vm3, %v60_v25  ;;  %1548 = vmatmul.mubr.msk.f32.gmra.mrb[4].mxu1 %vm96_vm3, %v60_v25  ;;  %v392_v53 = vld [vmem:[%s2589_s4] sm:$0xff]  ;;  %v2132_v54 = vld [vmem:[#allocation5 + $0xe8] ss:$16 sps:$4 sm:$0xff]  }
  0x38   :  { %596 = vmatpush1.bf16.msra.mxu0 %v2030_v27  ;;  %637 = vmatpush1.bf16.msra.mxu1 %v2034_v28  ;;  %v398_v55 = vpack.c.bf16 %v392_v53, %v392_v53  ;;  %v74_v60 = vld [vmem:[%s2588_s3] sm:$0xf] }
  0x39   :  { %216 = vmatprep.mubr.f32.mxu0 %v2594_v0  ;;  %329 = vmatprep.mubr.f32.mxu1 %v2594_v0  ;;  %v79_v5 = vrot.slane %v74_v60, %v78_v59  ;;  %v83_v6 = vrot.slane %v74_v60, %v82_v62  ;;  %v87_v8 = vrot.slane %v74_v60, %v86_v63 }
  0x3a   :  { %597 = vmatprep.subr.bf16.mxu0 %v2041_v30  ;;  %638 = vmatprep.subr.bf16.mxu1 %v2045_v31  ;;  %v91_v11 = vrot.slane %v74_v60, %v90_v3 }
  0x3b   :  { %1539 = vmatmul.mubr.msk.f32.gmra.mrb[6].mxu0 %vm96_vm3, %v61_v29  ;;  %1549 = vmatmul.mubr.msk.f32.gmra.mrb[6].mxu1 %vm96_vm3, %v61_v29 }
  0x3c   :  { %598 = vmatpush1.bf16.msra.mxu0 %v2049_v32  ;;  %639 = vmatpush1.bf16.msra.mxu1 %v2053_v33 }
  0x3d   :  { %222 = vmatprep.mubr.f32.mxu0 %v2594_v0  ;;  %335 = vmatprep.mubr.f32.mxu1 %v2594_v0 }
  0x3e   :  { %599 = vmatprep.subr.bf16.mxu0 %v2057_v34  ;;  %640 = vmatprep.subr.bf16.mxu1 %v2061_v35 }
  0x3f   :  { %1540 = vmatmul.mubr.msk.f32.gmra.mrb[8].mxu0 %vm96_vm3, %v62_v36  ;;  %1550 = vmatmul.mubr.msk.f32.gmra.mrb[8].mxu1 %vm96_vm3, %v62_v36 }
  0x40   :  { %600 = vmatpush1.bf16.msra.mxu0 %v2068_v37  ;;  %641 = vmatpush1.bf16.msra.mxu1 %v2072_v38 }
  0x41   :  { %228 = vmatprep.mubr.f32.mxu0 %v2594_v0  ;;  %341 = vmatprep.mubr.f32.mxu1 %v2594_v0 }
  0x42   :  { %601 = vmatprep.subr.bf16.mxu0 %v2076_v39  ;;  %642 = vmatprep.subr.bf16.mxu1 %v2083_v41 }
  0x43   :  { %1541 = vmatmul.mubr.msk.f32.gmra.mrb[10].mxu0 %vm96_vm3, %v63_v40  ;;  %1551 = vmatmul.mubr.msk.f32.gmra.mrb[10].mxu1 %vm96_vm3, %v63_v40 }
  0x44   :  { %602 = vmatpush1.bf16.msra.mxu0 %v2087_v42  ;;  %643 = vmatpush1.bf16.msra.mxu1 %v2091_v43 }
  0x45   :  { %234 = vmatprep.mubr.f32.mxu0 %v2594_v0  ;;  %347 = vmatprep.mubr.f32.mxu1 %v2594_v0 }
  0x46   :  { %603 = vmatprep.subr.bf16.mxu0 %v2095_v44  ;;  %644 = vmatprep.subr.bf16.mxu1 %v2099_v45 }
  0x47   :  { %1542 = vmatmul.mubr.msk.f32.gmra.mrb[12].mxu0 %vm96_vm3, %v64_v46  ;;  %1552 = vmatmul.mubr.msk.f32.gmra.mrb[12].mxu1 %vm96_vm3, %v64_v46 }
  0x48   :  { %604 = vmatpush1.bf16.msra.mxu0 %v2106_v47  ;;  %645 = vmatpush1.bf16.msra.mxu1 %v2110_v48 }
  0x49   :  { %240 = vmatprep.mubr.f32.mxu0 %v2594_v0  ;;  %353 = vmatprep.mubr.f32.mxu1 %v2594_v0 }
  0x4a   :  { %605 = vmatprep.subr.bf16.mxu0 %v2114_v49  ;;  %646 = vmatprep.subr.bf16.mxu1 %v2118_v50 }
  0x4b   :  { %1543 = vmatmul.mubr.msk.f32.gmra.mrb[14].mxu0 %vm96_vm3, %v65_v51  ;;  %1553 = vmatmul.mubr.msk.f32.gmra.mrb[14].mxu1 %vm96_vm3, %v65_v51 }
  0x4c   :  { %606 = vmatpush1.bf16.msra.mxu0 %v2125_v52  ;;  %647 = vmatpush1.bf16.msra.mxu1 %v2132_v54 }
  0x4d   :  { %623 = vmatprep.mubr.bf16.mxu0 %v2595_v56  ;;  %664 = vmatprep.mubr.bf16.mxu1 %v2595_v56 }
  0x4e   :  { %697 = vmatprep.subr.bf16.mxu0 %v1985_v15  ;;  %738 = vmatprep.subr.bf16.mxu1 %v1991_v16 }
  0x4f   :  { %624 = vmatmul.mubr.bf16.vlgmr.msra.gmra.mrb[16].mxu0 %v398_v55  ;;  %665 = vmatmul.mubr.bf16.vlgmr.msra.gmra.mrb[16].mxu1 %v398_v55 }
  0x50   :  { %698 = vmatpush1.bf16.msra.mxu0 %v1996_v17  ;;  %739 = vmatpush1.bf16.msra.mxu1 %v1998_v18 }
  0x51   :  { %699 = vmatprep.subr.bf16.mxu0 %v2001_v19  ;;  %740 = vmatprep.subr.bf16.mxu1 %v2004_v20 }
  0x52   :  { %729 = vmatprep.mubr.bf16.mxu0 %v2595_v56  ;;  %770 = vmatprep.mubr.bf16.mxu1 %v2595_v56 }
  0x54   :  { %700 = vmatpush1.bf16.msra.mxu0 %v2011_v22  ;;  %741 = vmatpush1.bf16.msra.mxu1 %v2015_v23 }
  0x55   :  { %701 = vmatprep.subr.bf16.mxu0 %v2019_v24  ;;  %742 = vmatprep.subr.bf16.mxu1 %v2026_v26 }
  0x58   :  { %702 = vmatpush1.bf16.msra.mxu0 %v2030_v27  ;;  %743 = vmatpush1.bf16.msra.mxu1 %v2034_v28 }
  0x59   :  { %703 = vmatprep.subr.bf16.mxu0 %v2041_v30  ;;  %744 = vmatprep.subr.bf16.mxu1 %v2045_v31 }
  0x5c   :  { %704 = vmatpush1.bf16.msra.mxu0 %v2049_v32  ;;  %745 = vmatpush1.bf16.msra.mxu1 %v2053_v33 }
  0x5d   :  { %705 = vmatprep.subr.bf16.mxu0 %v2057_v34  ;;  %746 = vmatprep.subr.bf16.mxu1 %v2061_v35 }
  0x60   :  { %706 = vmatpush1.bf16.msra.mxu0 %v2068_v37  ;;  %747 = vmatpush1.bf16.msra.mxu1 %v2072_v38 }
  0x61   :  { %707 = vmatprep.subr.bf16.mxu0 %v2076_v39  ;;  %748 = vmatprep.subr.bf16.mxu1 %v2083_v41 }
  0x64   :  { %708 = vmatpush1.bf16.msra.mxu0 %v2087_v42  ;;  %749 = vmatpush1.bf16.msra.mxu1 %v2091_v43 }
  0x65   :  { %709 = vmatprep.subr.bf16.mxu0 %v2095_v44  ;;  %750 = vmatprep.subr.bf16.mxu1 %v2099_v45 }
  0x68   :  { %710 = vmatpush1.bf16.msra.mxu0 %v2106_v47  ;;  %751 = vmatpush1.bf16.msra.mxu1 %v2110_v48 }
  0x69   :  { %711 = vmatprep.subr.bf16.mxu0 %v2114_v49  ;;  %752 = vmatprep.subr.bf16.mxu1 %v2118_v50 }
  0x6c   :  { %712 = vmatpush1.bf16.msra.mxu0 %v2125_v52  ;;  %753 = vmatpush1.bf16.msra.mxu1 %v2132_v54 }
  0x6d   :  { %803 = vmatprep.subr.bf16.mxu0 %v1985_v15  ;;  %844 = vmatprep.subr.bf16.mxu1 %v1991_v16 }
 0x102   :  { %v2182_v61 = vpop.f32.mrb[0].mxu0  ;;  %v2186_v2 = vpop.f32.mrb[0].mxu1 }
 0x103   :  { %v2184_v1 = vpop.f32.mrb[1].mxu0  ;;  %v2188_v4 = vpop.f32.mrb[1].mxu1 }
 0x106   :  { %v206_v7 = vpop.f32.mrb[2].mxu0  ;;  %v319_v12 = vpop.f32.mrb[2].mxu1 }
 0x107   :  { %v2190_v9 = vadd.f32 %v206_v7, %v79_v5  ;;  %v208_v10 = vpop.f32.mrb[3].mxu0  ;;  %v2194_v14 = vadd.f32 %v319_v12, %v87_v8  ;;  %v321_v21 = vpop.f32.mrb[3].mxu1 }
 0x108   :  { %v2192_v13 = vadd.f32 %v208_v10, %v83_v6  ;;  %v2196_v25 = vadd.f32 %v321_v21, %v91_v11 }
 0x10a   :  { %v212_v29 = vpop.f32.mrb[4].mxu0  ;;  %v325_v46 = vpop.f32.mrb[4].mxu1 }
 0x10b   :  { %v2198_v36 = vadd.f32 %v212_v29, %v79_v5  ;;  %v214_v40 = vpop.f32.mrb[5].mxu0  ;;  %v2202_v53 = vadd.f32 %v325_v46, %v87_v8  ;;  %v327_v55 = vpop.f32.mrb[5].mxu1 }
 0x10c   :  { %v2200_v51 = vadd.f32 %v214_v40, %v83_v6  ;;  %v2204_v57 = vadd.f32 %v327_v55, %v91_v11 }
 0x10e   :  { %v218_v58 = vpop.f32.mrb[6].mxu0  ;;  %v331_v62 = vpop.f32.mrb[6].mxu1 }
 0x10f   :  { %v2206_v59 = vadd.f32 %v218_v58, %v79_v5  ;;  %v220_v60 = vpop.f32.mrb[7].mxu0  ;;  %v2210_v3 = vadd.f32 %v331_v62, %v87_v8  ;;  %v333_v7 = vpop.f32.mrb[7].mxu1 }
 0x110   :  { %v2208_v63 = vadd.f32 %v220_v60, %v83_v6  ;;  %v2212_v10 = vadd.f32 %v333_v7, %v91_v11 }
 0x111   :  { %2599 = vst [vmem:[#allocation9_spill] sm:$0xff] %v2206_v59  ;;  %2601 = vst [vmem:[#allocation11_spill] sm:$0xff] %v2210_v3 }
 0x112   :  { %2600 = vst [vmem:[#allocation10_spill] sm:$0xff] %v2208_v63  ;;  %2602 = vst [vmem:[#allocation12_spill] sm:$0xff] %v2212_v10  ;;  %v224_v12 = vpop.f32.mrb[8].mxu0  ;;  %v337_v40 = vpop.f32.mrb[8].mxu1 }
 0x113   :  { %v2214_v21 = vadd.f32 %v224_v12, %v79_v5  ;;  %v226_v29 = vpop.f32.mrb[9].mxu0  ;;  %v2218_v55 = vadd.f32 %v337_v40, %v87_v8  ;;  %v339_v58 = vpop.f32.mrb[9].mxu1 }
 0x114   :  { %v2216_v46 = vadd.f32 %v226_v29, %v83_v6  ;;  %v2220_v0 = vadd.f32 %v339_v58, %v91_v11 }
 0x115   :  { %2603 = vst [vmem:[#allocation13_spill] sm:$0xff] %v2214_v21  ;;  %2605 = vst [vmem:[#allocation15_spill] sm:$0xff] %v2218_v55 }
 0x116   :  { %2604 = vst [vmem:[#allocation14_spill] sm:$0xff] %v2216_v46  ;;  %2606 = vst [vmem:[#allocation16_spill] sm:$0xff] %v2220_v0  ;;  %v230_v56 = vpop.f32.mrb[10].mxu0  ;;  %v343_v63 = vpop.f32.mrb[10].mxu1 }
 0x117   :  { %v2222_v60 = vadd.f32 %v230_v56, %v79_v5  ;;  %v232_v62 = vpop.f32.mrb[11].mxu0  ;;  %v2226_v7 = vadd.f32 %v343_v63, %v87_v8  ;;  %v345_v12 = vpop.f32.mrb[11].mxu1 }
 0x118   :  { %v2224_v3 = vadd.f32 %v232_v62, %v83_v6  ;;  %v2228_v21 = vadd.f32 %v345_v12, %v91_v11 }
 0x119   :  { %2607 = vst [vmem:[#allocation17_spill] sm:$0xff] %v2222_v60  ;;  %2609 = vst [vmem:[#allocation19_spill] sm:$0xff] %v2226_v7 }
 0x11a   :  { %2608 = vst [vmem:[#allocation18_spill] sm:$0xff] %v2224_v3  ;;  %2610 = vst [vmem:[#allocation20_spill] sm:$0xff] %v2228_v21  ;;  %v236_v10 = vpop.f32.mrb[12].mxu0  ;;  %v349_v46 = vpop.f32.mrb[12].mxu1 }
 0x11b   :  { %v2230_v29 = vadd.f32 %v236_v10, %v79_v5  ;;  %v238_v40 = vpop.f32.mrb[13].mxu0  ;;  %v2234_v58 = vadd.f32 %v349_v46, %v87_v8  ;;  %v351_v56 = vpop.f32.mrb[13].mxu1  ;;  %v203_v46 = vadd.f32 %v2184_v1, %v83_v6 }
 0x11c   :  { %v2232_v55 = vadd.f32 %v238_v40, %v83_v6  ;;  %v2236_v60 = vadd.f32 %v351_v56, %v91_v11  ;;  %v314_v40 = vadd.f32 %v2186_v2, %v87_v8 }
 0x11d   :  { %2611 = vst [vmem:[#allocation21_spill] sm:$0xff] %v2230_v29  ;;  %2613 = vst [vmem:[#allocation23_spill] sm:$0xff] %v2234_v58  ;;  %v201_v29 = vadd.f32 %v2182_v61, %v79_v5 }
 0x11e   :  { %2612 = vst [vmem:[#allocation22_spill] sm:$0xff] %v2232_v55  ;;  %2614 = vst [vmem:[#allocation24_spill] sm:$0xff] %v2236_v60  ;;  %v242_v0 = vpop.f32.mrb[14].mxu0  ;;  %v355_v3 = vpop.f32.mrb[14].mxu1  ;;  %v316_v60 = vadd.f32 %v2188_v4, %v91_v11 }
 0x11f   :  { %v2238_v62 = vadd.f32 %v242_v0, %v79_v5  ;;  %v244_v63 = vpop.f32.mrb[15].mxu0  ;;  %v2242_v12 = vadd.f32 %v355_v3, %v87_v8  ;;  %v357_v10 = vpop.f32.mrb[15].mxu1 }
 0x120   :  { %v2240_v7 = vadd.f32 %v244_v63, %v83_v6  ;;  %v2245_v21 = vadd.f32 %v357_v10, %v91_v11 }
 0x121   :  { %2615 = vst [vmem:[#allocation25_spill] sm:$0xff] %v2238_v62  ;;  %2617 = vst [vmem:[#allocation27_spill] sm:$0xff] %v2242_v12 }
 0x122   :  { %2616 = vst [vmem:[#allocation26_spill] sm:$0xff] %v2240_v7  ;;  %v625_v56 = vpop.f32.mrb[16].mxu0  ;;  %v666_v62 = vpop.f32.mrb[16].mxu1 }
 0x123   :  { %v673_v0 = vadd.f32 %v625_v56, %v201_v29  ;;  %v627_v55 = vpop.f32.mrb[17].mxu0  ;;  %v675_v58 = vadd.f32 %v666_v62, %v314_v40  ;;  %v668_v7 = vpop.f32.mrb[17].mxu1 }
 0x124   :  { %v674_v63 = vadd.f32 %v627_v55, %v203_v46  ;;  %v629_v3 = vpop.f32.mrb[18].mxu0  ;;  %v676_v12 = vadd.f32 %v668_v7, %v316_v60  ;;  %v670_v61 = vpop.f32.mrb[18].mxu1  ;;  %v393_v55 = vld [vmem:[%s2590_s5] sm:$0xff] }
 0x125   :  { %1734 = vtanh.f32 %v673_v0  ;;  %v630_v59 = vpop.f32.mrb[19].mxu0  ;;  %v671_v5 = vpop.f32.mrb[19].mxu1 }
 0x126   :  { %1736 = vtanh.f32 %v674_v63 }
 0x127   :  { %1738 = vtanh.f32 %v676_v12 }
 0x128   :  { %1740 = vtanh.f32 %v675_v58  ;;  %v2618_v58 = vmov 0  }
 0x12f   :  { %v1735_v1 = vpop.eup %1734 }
 0x130   :  { %v681_v6 = vmul.f32 0.5, %v1735_v1  ;;  %v1737_v2 = vpop.eup %1736 }
 0x131   :  { %v682_v4 = vmul.f32 0.5, %v1737_v2  ;;  %v1739_v11 = vpop.eup %1738 }
 0x132   :  { %v684_v8 = vadd.f32 0.5, %v681_v6  ;;  %v1741_v59 = vpop.eup %1740 }
 0x133   :  { %v685_v29 = vadd.f32 0.5, %v682_v4  ;;  %v683_v7 = vmul.f32 0.5, %v1741_v59 }
 0x134   :  { %v688_v62 = vmul.f32 %v1739_v11, %v684_v8 }
 0x135   :  { %v687_v10 = vmul.f32 %v685_v29, %v393_v55  ;;  %v686_v12 = vadd.f32 0.5, %v683_v7 }
 0x137   :  { %v2253_v60 = vadd.f32 %v688_v62, %v687_v10 }
 0x139   :  { %1742 = vtanh.f32 %v2253_v60 }
 0x143   :  { %v1743_v46 = vpop.eup %1742 }
 0x144   :  { %v691_v40 = vmul.f32 %v1743_v46, %v686_v12 }
 0x146   :  { %v696_v56 = vpack.c.bf16 %v691_v40, %v691_v40 }
 0x148   :  { %730 = vmatmul.mubr.bf16.vlgmr.msra.gmra.mrb[20].mxu0 %v696_v56  ;;  %771 = vmatmul.mubr.bf16.vlgmr.msra.gmra.mrb[20].mxu1 %v696_v56 }
 0x149   :  { %804 = vmatpush1.bf16.msra.mxu0 %v1996_v17  ;;  %845 = vmatpush1.bf16.msra.mxu1 %v1998_v18 }
 0x14a   :  { %805 = vmatprep.subr.bf16.mxu0 %v2001_v19  ;;  %846 = vmatprep.subr.bf16.mxu1 %v2004_v20 }
 0x14b   :  { %835 = vmatprep.mubr.bf16.mxu0 %v2618_v58  ;;  %876 = vmatprep.mubr.bf16.mxu1 %v2618_v58 }
 0x14d   :  { %806 = vmatpush1.bf16.msra.mxu0 %v2011_v22  ;;  %847 = vmatpush1.bf16.msra.mxu1 %v2015_v23 }
 0x14e   :  { %807 = vmatprep.subr.bf16.mxu0 %v2019_v24  ;;  %848 = vmatprep.subr.bf16.mxu1 %v2026_v26 }
 0x151   :  { %808 = vmatpush1.bf16.msra.mxu0 %v2030_v27  ;;  %849 = vmatpush1.bf16.msra.mxu1 %v2034_v28 }
 0x152   :  { %809 = vmatprep.subr.bf16.mxu0 %v2041_v30  ;;  %850 = vmatprep.subr.bf16.mxu1 %v2045_v31 }
 0x155   :  { %810 = vmatpush1.bf16.msra.mxu0 %v2049_v32  ;;  %851 = vmatpush1.bf16.msra.mxu1 %v2053_v33 }
 0x156   :  { %811 = vmatprep.subr.bf16.mxu0 %v2057_v34  ;;  %852 = vmatprep.subr.bf16.mxu1 %v2061_v35 }
 0x159   :  { %812 = vmatpush1.bf16.msra.mxu0 %v2068_v37  ;;  %853 = vmatpush1.bf16.msra.mxu1 %v2072_v38 }
 0x15a   :  { %813 = vmatprep.subr.bf16.mxu0 %v2076_v39  ;;  %854 = vmatprep.subr.bf16.mxu1 %v2083_v41 }
 0x15d   :  { %814 = vmatpush1.bf16.msra.mxu0 %v2087_v42  ;;  %855 = vmatpush1.bf16.msra.mxu1 %v2091_v43 }
 0x15e   :  { %815 = vmatprep.subr.bf16.mxu0 %v2095_v44  ;;  %856 = vmatprep.subr.bf16.mxu1 %v2099_v45 }
 0x161   :  { %816 = vmatpush1.bf16.msra.mxu0 %v2106_v47  ;;  %857 = vmatpush1.bf16.msra.mxu1 %v2110_v48 }
 0x162   :  { %817 = vmatprep.subr.bf16.mxu0 %v2114_v49  ;;  %858 = vmatprep.subr.bf16.mxu1 %v2118_v50 }
 0x165   :  { %818 = vmatpush1.bf16.msra.mxu0 %v2125_v52  ;;  %859 = vmatpush1.bf16.msra.mxu1 %v2132_v54 }
 0x166   :  { %909 = vmatprep.subr.bf16.mxu0 %v1985_v15  ;;  %950 = vmatprep.subr.bf16.mxu1 %v1991_v16 }
 0x21b   :  { %v731_v0 = vpop.f32.mrb[20].mxu0  ;;  %v772_v63 = vpop.f32.mrb[20].mxu1 }
 0x21c   :  { %v779_v3 = vadd.f32 %v731_v0, %v2190_v9  ;;  %v781_v61 = vadd.f32 %v772_v63, %v2194_v14  ;;  %v733_v5 = vpop.f32.mrb[21].mxu0  ;;  %v774_v1 = vpop.f32.mrb[21].mxu1 }
 0x21d   :  { %v780_v6 = vadd.f32 %v733_v5, %v2192_v13  ;;  %v782_v2 = vadd.f32 %v774_v1, %v2196_v25  ;;  %v735_v8 = vpop.f32.mrb[22].mxu0  ;;  %v776_v4 = vpop.f32.mrb[22].mxu1 }
 0x21e   :  { %1744 = vtanh.f32 %v779_v3  ;;  %v736_v11 = vpop.f32.mrb[23].mxu0  ;;  %v777_v55 = vpop.f32.mrb[23].mxu1 }
 0x21f   :  { %1746 = vtanh.f32 %v780_v6 }
 0x220   :  { %1748 = vtanh.f32 %v782_v2 }
 0x221   :  { %1750 = vtanh.f32 %v781_v61 }
 0x228   :  { %v1745_v29 = vpop.eup %1744 }
 0x229   :  { %v787_v62 = vmul.f32 0.5, %v1745_v29  ;;  %v1747_v10 = vpop.eup %1746 }
 0x22a   :  { %v788_v9 = vmul.f32 0.5, %v1747_v10  ;;  %v1749_v14 = vpop.eup %1748 }
 0x22b   :  { %v790_v59 = vadd.f32 0.5, %v787_v62  ;;  %v1751_v25 = vpop.eup %1750 }
 0x22c   :  { %v791_v7 = vadd.f32 0.5, %v788_v9  ;;  %v789_v40 = vmul.f32 0.5, %v1751_v25 }
 0x22d   :  { %v794_v12 = vmul.f32 %v1749_v14, %v790_v59 }
 0x22e   :  { %v793_v13 = vmul.f32 %v791_v7, %v2253_v60  ;;  %v792_v56 = vadd.f32 0.5, %v789_v40 }
 0x230   :  { %v2295_v46 = vadd.f32 %v794_v12, %v793_v13 }
 0x232   :  { %1752 = vtanh.f32 %v2295_v46 }
 0x23c   :  { %v1753_v0 = vpop.eup %1752 }
 0x23d   :  { %v797_v63 = vmul.f32 %v1753_v0, %v792_v56 }
 0x23f   :  { %v802_v3 = vpack.c.bf16 %v797_v63, %v797_v63 }
 0x241   :  { %836 = vmatmul.mubr.bf16.vlgmr.msra.gmra.mrb[24].mxu0 %v802_v3  ;;  %877 = vmatmul.mubr.bf16.vlgmr.msra.gmra.mrb[24].mxu1 %v802_v3 }
 0x242   :  { %910 = vmatpush1.bf16.msra.mxu0 %v1996_v17  ;;  %951 = vmatpush1.bf16.msra.mxu1 %v1998_v18 }
 0x243   :  { %911 = vmatprep.subr.bf16.mxu0 %v2001_v19  ;;  %952 = vmatprep.subr.bf16.mxu1 %v2004_v20 }
 0x244   :  { %941 = vmatprep.mubr.bf16.mxu0 %v2618_v58  ;;  %982 = vmatprep.mubr.bf16.mxu1 %v2618_v58 }
 0x246   :  { %912 = vmatpush1.bf16.msra.mxu0 %v2011_v22  ;;  %953 = vmatpush1.bf16.msra.mxu1 %v2015_v23 }
 0x247   :  { %913 = vmatprep.subr.bf16.mxu0 %v2019_v24  ;;  %954 = vmatprep.subr.bf16.mxu1 %v2026_v26 }
 0x24a   :  { %914 = vmatpush1.bf16.msra.mxu0 %v2030_v27  ;;  %955 = vmatpush1.bf16.msra.mxu1 %v2034_v28 }
 0x24b   :  { %915 = vmatprep.subr.bf16.mxu0 %v2041_v30  ;;  %956 = vmatprep.subr.bf16.mxu1 %v2045_v31 }
 0x24e   :  { %916 = vmatpush1.bf16.msra.mxu0 %v2049_v32  ;;  %957 = vmatpush1.bf16.msra.mxu1 %v2053_v33 }
 0x24f   :  { %917 = vmatprep.subr.bf16.mxu0 %v2057_v34  ;;  %958 = vmatprep.subr.bf16.mxu1 %v2061_v35 }
 0x252   :  { %918 = vmatpush1.bf16.msra.mxu0 %v2068_v37  ;;  %959 = vmatpush1.bf16.msra.mxu1 %v2072_v38 }
 0x253   :  { %919 = vmatprep.subr.bf16.mxu0 %v2076_v39  ;;  %960 = vmatprep.subr.bf16.mxu1 %v2083_v41 }
 0x256   :  { %920 = vmatpush1.bf16.msra.mxu0 %v2087_v42  ;;  %961 = vmatpush1.bf16.msra.mxu1 %v2091_v43 }
 0x257   :  { %921 = vmatprep.subr.bf16.mxu0 %v2095_v44  ;;  %962 = vmatprep.subr.bf16.mxu1 %v2099_v45 }
 0x25a   :  { %922 = vmatpush1.bf16.msra.mxu0 %v2106_v47  ;;  %963 = vmatpush1.bf16.msra.mxu1 %v2110_v48 }
 0x25b   :  { %923 = vmatprep.subr.bf16.mxu0 %v2114_v49  ;;  %964 = vmatprep.subr.bf16.mxu1 %v2118_v50 }
 0x25e   :  { %924 = vmatpush1.bf16.msra.mxu0 %v2125_v52  ;;  %965 = vmatpush1.bf16.msra.mxu1 %v2132_v54 }
 0x25f   :  { %1015 = vmatprep.subr.bf16.mxu0 %v1985_v15  ;;  %1056 = vmatprep.subr.bf16.mxu1 %v1991_v16 }
 0x314   :  { %v837_v60 = vpop.f32.mrb[24].mxu0  ;;  %v878_v61 = vpop.f32.mrb[24].mxu1 }
 0x315   :  { %v885_v5 = vadd.f32 %v837_v60, %v2198_v36  ;;  %v887_v1 = vadd.f32 %v878_v61, %v2202_v53  ;;  %v839_v6 = vpop.f32.mrb[25].mxu0  ;;  %v880_v2 = vpop.f32.mrb[25].mxu1  ;;  %v2619_v60 = vld [vmem:[#allocation9_spill] sm:$0xff] }
 0x316   :  { %v886_v8 = vadd.f32 %v839_v6, %v2200_v51  ;;  %v888_v4 = vadd.f32 %v880_v2, %v2204_v57  ;;  %v841_v11 = vpop.f32.mrb[26].mxu0  ;;  %v882_v55 = vpop.f32.mrb[26].mxu1 }
 0x317   :  { %1754 = vtanh.f32 %v885_v5  ;;  %v842_v29 = vpop.f32.mrb[27].mxu0  ;;  %v883_v62 = vpop.f32.mrb[27].mxu1  ;;  %v2620_v5 = vld [vmem:[#allocation11_spill] sm:$0xff]  ;;  %v2622_v11 = vld [vmem:[#allocation12_spill] sm:$0xff] }
 0x318   :  { %1756 = vtanh.f32 %v886_v8  ;;  %v2621_v8 = vld [vmem:[#allocation10_spill] sm:$0xff] }
 0x319   :  { %1758 = vtanh.f32 %v888_v4 }
 0x31a   :  { %1760 = vtanh.f32 %v887_v1 }
 0x321   :  { %v1755_v10 = vpop.eup %1754 }
 0x322   :  { %v893_v59 = vmul.f32 0.5, %v1755_v10  ;;  %v1757_v9 = vpop.eup %1756 }
 0x323   :  { %v894_v36 = vmul.f32 0.5, %v1757_v9  ;;  %v1759_v53 = vpop.eup %1758 }
 0x324   :  { %v896_v14 = vadd.f32 0.5, %v893_v59  ;;  %v1761_v57 = vpop.eup %1760 }
 0x325   :  { %v897_v7 = vadd.f32 0.5, %v894_v36  ;;  %v895_v25 = vmul.f32 0.5, %v1761_v57 }
 0x326   :  { %v900_v12 = vmul.f32 %v1759_v53, %v896_v14 }
 0x327   :  { %v899_v51 = vmul.f32 %v897_v7, %v2295_v46  ;;  %v898_v40 = vadd.f32 0.5, %v895_v25 }
 0x329   :  { %v2337_v13 = vadd.f32 %v900_v12, %v899_v51 }
 0x32b   :  { %1762 = vtanh.f32 %v2337_v13 }
 0x335   :  { %v1763_v56 = vpop.eup %1762 }
 0x336   :  { %v903_v0 = vmul.f32 %v1763_v56, %v898_v40 }
 0x338   :  { %v908_v63 = vpack.c.bf16 %v903_v0, %v903_v0 }
 0x33a   :  { %942 = vmatmul.mubr.bf16.vlgmr.msra.gmra.mrb[28].mxu0 %v908_v63  ;;  %983 = vmatmul.mubr.bf16.vlgmr.msra.gmra.mrb[28].mxu1 %v908_v63 }
 0x33b   :  { %1016 = vmatpush1.bf16.msra.mxu0 %v1996_v17  ;;  %1057 = vmatpush1.bf16.msra.mxu1 %v1998_v18 }
 0x33c   :  { %1017 = vmatprep.subr.bf16.mxu0 %v2001_v19  ;;  %1058 = vmatprep.subr.bf16.mxu1 %v2004_v20 }
 0x33d   :  { %1047 = vmatprep.mubr.bf16.mxu0 %v2618_v58  ;;  %1088 = vmatprep.mubr.bf16.mxu1 %v2618_v58 }
 0x33f   :  { %1018 = vmatpush1.bf16.msra.mxu0 %v2011_v22  ;;  %1059 = vmatpush1.bf16.msra.mxu1 %v2015_v23 }
 0x340   :  { %1019 = vmatprep.subr.bf16.mxu0 %v2019_v24  ;;  %1060 = vmatprep.subr.bf16.mxu1 %v2026_v26 }
 0x343   :  { %1020 = vmatpush1.bf16.msra.mxu0 %v2030_v27  ;;  %1061 = vmatpush1.bf16.msra.mxu1 %v2034_v28 }
 0x344   :  { %1021 = vmatprep.subr.bf16.mxu0 %v2041_v30  ;;  %1062 = vmatprep.subr.bf16.mxu1 %v2045_v31 }
 0x347   :  { %1022 = vmatpush1.bf16.msra.mxu0 %v2049_v32  ;;  %1063 = vmatpush1.bf16.msra.mxu1 %v2053_v33 }
 0x348   :  { %1023 = vmatprep.subr.bf16.mxu0 %v2057_v34  ;;  %1064 = vmatprep.subr.bf16.mxu1 %v2061_v35 }
 0x34b   :  { %1024 = vmatpush1.bf16.msra.mxu0 %v2068_v37  ;;  %1065 = vmatpush1.bf16.msra.mxu1 %v2072_v38 }
 0x34c   :  { %1025 = vmatprep.subr.bf16.mxu0 %v2076_v39  ;;  %1066 = vmatprep.subr.bf16.mxu1 %v2083_v41 }
 0x34f   :  { %1026 = vmatpush1.bf16.msra.mxu0 %v2087_v42  ;;  %1067 = vmatpush1.bf16.msra.mxu1 %v2091_v43 }
 0x350   :  { %1027 = vmatprep.subr.bf16.mxu0 %v2095_v44  ;;  %1068 = vmatprep.subr.bf16.mxu1 %v2099_v45 }
 0x353   :  { %1028 = vmatpush1.bf16.msra.mxu0 %v2106_v47  ;;  %1069 = vmatpush1.bf16.msra.mxu1 %v2110_v48 }
 0x354   :  { %1029 = vmatprep.subr.bf16.mxu0 %v2114_v49  ;;  %1070 = vmatprep.subr.bf16.mxu1 %v2118_v50 }
 0x357   :  { %1030 = vmatpush1.bf16.msra.mxu0 %v2125_v52  ;;  %1071 = vmatpush1.bf16.msra.mxu1 %v2132_v54 }
 0x358   :  { %1121 = vmatprep.subr.bf16.mxu0 %v1985_v15  ;;  %1162 = vmatprep.subr.bf16.mxu1 %v1991_v16 }
 0x40d   :  { %v943_v46 = vpop.f32.mrb[28].mxu0  ;;  %v984_v3 = vpop.f32.mrb[28].mxu1 }
 0x40e   :  { %v991_v61 = vadd.f32 %v943_v46, %v2619_v60  ;;  %v993_v1 = vadd.f32 %v984_v3, %v2620_v5  ;;  %v945_v6 = vpop.f32.mrb[29].mxu0  ;;  %v986_v2 = vpop.f32.mrb[29].mxu1 }
 0x40f   :  { %v992_v4 = vadd.f32 %v945_v6, %v2621_v8  ;;  %v994_v55 = vadd.f32 %v986_v2, %v2622_v11  ;;  %v947_v29 = vpop.f32.mrb[30].mxu0  ;;  %v988_v62 = vpop.f32.mrb[30].mxu1 }
 0x410   :  { %1764 = vtanh.f32 %v991_v61  ;;  %v948_v10 = vpop.f32.mrb[31].mxu0  ;;  %v989_v59 = vpop.f32.mrb[31].mxu1 }
 0x411   :  { %1766 = vtanh.f32 %v992_v4 }
 0x412   :  { %1768 = vtanh.f32 %v994_v55 }
 0x413   :  { %1770 = vtanh.f32 %v993_v1 }
 0x41a   :  { %v1765_v15 = vpop.eup %1764 }
 0x41b   :  { %v999_v16 = vmul.f32 0.5, %v1765_v15  ;;  %v1767_v9 = vpop.eup %1766 }
 0x41c   :  { %v1000_v36 = vmul.f32 0.5, %v1767_v9  ;;  %v1769_v53 = vpop.eup %1768 }
 0x41d   :  { %v1002_v14 = vadd.f32 0.5, %v999_v16  ;;  %v1771_v25 = vpop.eup %1770 }
 0x41e   :  { %v1003_v7 = vadd.f32 0.5, %v1000_v36  ;;  %v1001_v40 = vmul.f32 0.5, %v1771_v25  ;;  %v2431_v36 = vld [vmem:[#allocation5 + $0x8] ss:$16 sps:$4 sm:$0xff]   ;;  %v2451_v25 = vld [vmem:[#allocation5 + $0x4c] ss:$16 sps:$4 sm:$0xff]  }
 0x41f   :  { %v1006_v12 = vmul.f32 %v1769_v53, %v1002_v14  ;;  %v2428_v14 = vld [vmem:[#allocation5] ss:$16 sps:$4 sm:$0xff]   ;;  %v2434_v53 = vld [vmem:[#allocation5 + $0x24] ss:$16 sps:$4 sm:$0xff]  }
 0x420   :  { %v1005_v51 = vmul.f32 %v1003_v7, %v2337_v13  ;;  %v1004_v56 = vadd.f32 0.5, %v1001_v40  ;;  %v2437_v7 = vld [vmem:[#allocation5 + $0x2c] ss:$16 sps:$4 sm:$0xff]   ;;  %v2454_v40 = vld [vmem:[#allocation5 + $0x40] ss:$16 sps:$4 sm:$0xff]  }
 0x422   :  { %v2379_v57 = vadd.f32 %v1006_v12, %v1005_v51  ;;  %v2442_v12 = vld [vmem:[#allocation5 + $0x20] ss:$16 sps:$4 sm:$0xff]   ;;  %v2445_v51 = vld [vmem:[#allocation5 + $0x28] ss:$16 sps:$4 sm:$0xff]  }
 0x424   :  { %1772 = vtanh.f32 %v2379_v57 }
 0x42e   :  { %v1773_v0 = vpop.eup %1772 }
 0x42f   :  { %v1009_v63 = vmul.f32 %v1773_v0, %v1004_v56  ;;  %v2457_v56 = vld [vmem:[#allocation5 + $0x48] ss:$16 sps:$4 sm:$0xff]   ;;  %v2460_v0 = vld [vmem:[#allocation5 + $0x64] ss:$16 sps:$4 sm:$0xff]  }
 0x431   :  { %v1014_v46 = vpack.c.bf16 %v1009_v63, %v1009_v63  ;;  %v2463_v63 = vld [vmem:[#allocation5 + $0x6c] ss:$16 sps:$4 sm:$0xff]  }
 0x433   :  { %1048 = vmatmul.mubr.bf16.vlgmr.msra.gmra.mrb[32].mxu0 %v1014_v46  ;;  %1089 = vmatmul.mubr.bf16.vlgmr.msra.gmra.mrb[32].mxu1 %v1014_v46  ;;  %v2466_v46 = vld [vmem:[#allocation5 + $0x60] ss:$16 sps:$4 sm:$0xff]  }
 0x434   :  { %1122 = vmatpush1.bf16.msra.mxu0 %v1996_v17  ;;  %1163 = vmatpush1.bf16.msra.mxu1 %v1998_v18  ;;  %v2414_v17 = vld [vmem:[#allocation5 + $0x4] ss:$16 sps:$4 sm:$0xff]   ;;  %v2417_v18 = vld [vmem:[#allocation5 + $0xc] ss:$16 sps:$4 sm:$0xff]  }
 0x435   :  { %1123 = vmatprep.subr.bf16.mxu0 %v2001_v19  ;;  %1164 = vmatprep.subr.bf16.mxu1 %v2004_v20 }
 0x436   :  { %1153 = vmatprep.mubr.bf16.mxu0 %v2618_v58  ;;  %1194 = vmatprep.mubr.bf16.mxu1 %v2618_v58 }
 0x438   :  { %1124 = vmatpush1.bf16.msra.mxu0 %v2011_v22  ;;  %1165 = vmatpush1.bf16.msra.mxu1 %v2015_v23  ;;  %v2623_v22 = vld [vmem:[#allocation13_spill] sm:$0xff] }
 0x439   :  { %1125 = vmatprep.subr.bf16.mxu0 %v2019_v24  ;;  %1166 = vmatprep.subr.bf16.mxu1 %v2026_v26  ;;  %v2624_v24 = vld [vmem:[#allocation15_spill] sm:$0xff] }
 0x43c   :  { %1126 = vmatpush1.bf16.msra.mxu0 %v2030_v27  ;;  %1167 = vmatpush1.bf16.msra.mxu1 %v2034_v28 }
 0x43d   :  { %1127 = vmatprep.subr.bf16.mxu0 %v2041_v30  ;;  %1168 = vmatprep.subr.bf16.mxu1 %v2045_v31  ;;  %v2625_v30 = vld [vmem:[#allocation14_spill] sm:$0xff] }
 0x440   :  { %1128 = vmatpush1.bf16.msra.mxu0 %v2049_v32  ;;  %1169 = vmatpush1.bf16.msra.mxu1 %v2053_v33  ;;  %v2626_v32 = vld [vmem:[#allocation16_spill] sm:$0xff] }
 0x441   :  { %1129 = vmatprep.subr.bf16.mxu0 %v2057_v34  ;;  %1170 = vmatprep.subr.bf16.mxu1 %v2061_v35 }
 0x444   :  { %1130 = vmatpush1.bf16.msra.mxu0 %v2068_v37  ;;  %1171 = vmatpush1.bf16.msra.mxu1 %v2072_v38 }
 0x445   :  { %1131 = vmatprep.subr.bf16.mxu0 %v2076_v39  ;;  %1172 = vmatprep.subr.bf16.mxu1 %v2083_v41 }
 0x448   :  { %1132 = vmatpush1.bf16.msra.mxu0 %v2087_v42  ;;  %1173 = vmatpush1.bf16.msra.mxu1 %v2091_v43 }
 0x449   :  { %1133 = vmatprep.subr.bf16.mxu0 %v2095_v44  ;;  %1174 = vmatprep.subr.bf16.mxu1 %v2099_v45 }
 0x44c   :  { %1134 = vmatpush1.bf16.msra.mxu0 %v2106_v47  ;;  %1175 = vmatpush1.bf16.msra.mxu1 %v2110_v48 }
 0x44d   :  { %1135 = vmatprep.subr.bf16.mxu0 %v2114_v49  ;;  %1176 = vmatprep.subr.bf16.mxu1 %v2118_v50 }
 0x450   :  { %1136 = vmatpush1.bf16.msra.mxu0 %v2125_v52  ;;  %1177 = vmatpush1.bf16.msra.mxu1 %v2132_v54 }
 0x451   :  { %1227 = vmatprep.subr.bf16.mxu0 %v2414_v17  ;;  %1268 = vmatprep.subr.bf16.mxu1 %v2417_v18 }
 0x506   :  { %v1049_v19 = vpop.f32.mrb[32].mxu0  ;;  %v1090_v20 = vpop.f32.mrb[32].mxu1 }
 0x507   :  { %v1097_v23 = vadd.f32 %v1049_v19, %v2623_v22  ;;  %v1099_v26 = vadd.f32 %v1090_v20, %v2624_v24  ;;  %v1051_v27 = vpop.f32.mrb[33].mxu0  ;;  %v1092_v28 = vpop.f32.mrb[33].mxu1  ;;  %v2469_v19 = vld [vmem:[#allocation5 + $0x68] ss:$16 sps:$4 sm:$0xff]   ;;  %v2472_v20 = vld [vmem:[#allocation5 + $0x84] ss:$16 sps:$4 sm:$0xff]  }
 0x508   :  { %v1098_v31 = vadd.f32 %v1051_v27, %v2625_v30  ;;  %v1100_v33 = vadd.f32 %v1092_v28, %v2626_v32  ;;  %v1053_v34 = vpop.f32.mrb[34].mxu0  ;;  %v1094_v13 = vpop.f32.mrb[34].mxu1 }
 0x509   :  { %1774 = vtanh.f32 %v1097_v23  ;;  %v1054_v3 = vpop.f32.mrb[35].mxu0  ;;  %v1095_v60 = vpop.f32.mrb[35].mxu1 }
 0x50a   :  { %1776 = vtanh.f32 %v1098_v31 }
 0x50b   :  { %1778 = vtanh.f32 %v1100_v33 }
 0x50c   :  { %1780 = vtanh.f32 %v1099_v26 }
 0x513   :  { %v1775_v61 = vpop.eup %1774 }
 0x514   :  { %v1105_v5 = vmul.f32 0.5, %v1775_v61  ;;  %v1777_v1 = vpop.eup %1776 }
 0x515   :  { %v1106_v2 = vmul.f32 0.5, %v1777_v1  ;;  %v1779_v8 = vpop.eup %1778  ;;  %v1833_v1 = vld [vmem:[#allocation5 + $0x88] ss:$16 sps:$4 sm:$0xff]  }
 0x516   :  { %v1108_v6 = vadd.f32 0.5, %v1105_v5  ;;  %v1781_v62 = vpop.eup %1780  ;;  %v1832_v5 = vld [vmem:[#allocation5 + $0x80] ss:$16 sps:$4 sm:$0xff]  }
 0x517   :  { %v1109_v4 = vadd.f32 0.5, %v1106_v2  ;;  %v1107_v10 = vmul.f32 0.5, %v1781_v62  ;;  %v1835_v2 = vld [vmem:[#allocation5 + $0xac] ss:$16 sps:$4 sm:$0xff]   ;;  %v1841_v62 = vld [vmem:[#allocation5 + $0xc8] ss:$16 sps:$4 sm:$0xff]  }
 0x518   :  { %v1112_v11 = vmul.f32 %v1779_v8, %v1108_v6  ;;  %v1834_v6 = vld [vmem:[#allocation5 + $0xa4] ss:$16 sps:$4 sm:$0xff]   ;;  %v1836_v8 = vld [vmem:[#allocation5 + $0xa0] ss:$16 sps:$4 sm:$0xff]  }
 0x519   :  { %v1111_v55 = vmul.f32 %v1109_v4, %v2379_v57  ;;  %v1110_v59 = vadd.f32 0.5, %v1107_v10  ;;  %v2448_v57 = vld [vmem:[#allocation5 + $0x44] ss:$16 sps:$4 sm:$0xff]   ;;  %v1837_v4 = vld [vmem:[#allocation5 + $0xa8] ss:$16 sps:$4 sm:$0xff]  }
 0x51a   :  { %v1842_v10 = vld [vmem:[#allocation5 + $0xe4] ss:$16 sps:$4 sm:$0xff]  }
 0x51b   :  { %v2425_v29 = vadd.f32 %v1112_v11, %v1111_v55  ;;  %v1838_v11 = vld [vmem:[#allocation5 + $0xc4] ss:$16 sps:$4 sm:$0xff]   ;;  %v1839_v55 = vld [vmem:[#allocation5 + $0xcc] ss:$16 sps:$4 sm:$0xff]  }
 0x51d   :  { %1782 = vtanh.f32 %v2425_v29 }
 0x527   :  { %v1783_v15 = vpop.eup %1782 }
 0x528   :  { %v1115_v16 = vmul.f32 %v1783_v15, %v1110_v59  ;;  %v1843_v59 = vld [vmem:[#allocation5 + $0xec] ss:$16 sps:$4 sm:$0xff]   ;;  %v1844_v15 = vld [vmem:[#allocation5 + $0xe0] ss:$16 sps:$4 sm:$0xff]  }
 0x52a   :  { %v1120_v9 = vpack.c.bf16 %v1115_v16, %v1115_v16  ;;  %v1845_v16 = vld [vmem:[#allocation5 + $0xe8] ss:$16 sps:$4 sm:$0xff]  }
 0x52c   :  { %1154 = vmatmul.mubr.bf16.vlgmr.msra.gmra.mrb[36].mxu0 %v1120_v9  ;;  %1195 = vmatmul.mubr.bf16.vlgmr.msra.gmra.mrb[36].mxu1 %v1120_v9 }
 0x52d   :  { %1228 = vmatpush1.bf16.msra.mxu0 %v2428_v14  ;;  %1269 = vmatpush1.bf16.msra.mxu1 %v2431_v36 }
 0x52e   :  { %1229 = vmatprep.subr.bf16.mxu0 %v2434_v53  ;;  %1270 = vmatprep.subr.bf16.mxu1 %v2437_v7 }
 0x52f   :  { %1259 = vmatprep.mubr.bf16.mxu0 %v2618_v58  ;;  %1300 = vmatprep.mubr.bf16.mxu1 %v2618_v58 }
 0x531   :  { %1230 = vmatpush1.bf16.msra.mxu0 %v2442_v12  ;;  %1271 = vmatpush1.bf16.msra.mxu1 %v2445_v51 }
 0x532   :  { %1231 = vmatprep.subr.bf16.mxu0 %v2448_v57  ;;  %1272 = vmatprep.subr.bf16.mxu1 %v2451_v25 }
 0x535   :  { %1232 = vmatpush1.bf16.msra.mxu0 %v2454_v40  ;;  %1273 = vmatpush1.bf16.msra.mxu1 %v2457_v56 }
 0x536   :  { %1233 = vmatprep.subr.bf16.mxu0 %v2460_v0  ;;  %1274 = vmatprep.subr.bf16.mxu1 %v2463_v63 }
 0x539   :  { %1234 = vmatpush1.bf16.msra.mxu0 %v2466_v46  ;;  %1275 = vmatpush1.bf16.msra.mxu1 %v2469_v19 }
 0x53a   :  { %1235 = vmatprep.subr.bf16.mxu0 %v2472_v20  ;;  %1276 = vmatprep.subr.bf16.mxu1 %v2061_v35 }
 0x53d   :  { %1236 = vmatpush1.bf16.msra.mxu0 %v2068_v37  ;;  %1277 = vmatpush1.bf16.msra.mxu1 %v2072_v38  ;;  %v2627_v38 = vld [vmem:[#allocation17_spill] sm:$0xff] }
 0x53e   :  { %1237 = vmatprep.subr.bf16.mxu0 %v2076_v39  ;;  %1278 = vmatprep.subr.bf16.mxu1 %v2083_v41  ;;  %v2628_v41 = vld [vmem:[#allocation19_spill] sm:$0xff] }
 0x541   :  { %1238 = vmatpush1.bf16.msra.mxu0 %v2087_v42  ;;  %1279 = vmatpush1.bf16.msra.mxu1 %v2091_v43 }
 0x542   :  { %1239 = vmatprep.subr.bf16.mxu0 %v2095_v44  ;;  %1280 = vmatprep.subr.bf16.mxu1 %v2099_v45  ;;  %v2629_v45 = vld [vmem:[#allocation18_spill] sm:$0xff] }
 0x545   :  { %1240 = vmatpush1.bf16.msra.mxu0 %v2106_v47  ;;  %1281 = vmatpush1.bf16.msra.mxu1 %v2110_v48  ;;  %v2630_v48 = vld [vmem:[#allocation20_spill] sm:$0xff] }
 0x546   :  { %1241 = vmatprep.subr.bf16.mxu0 %v2114_v49  ;;  %1282 = vmatprep.subr.bf16.mxu1 %v2118_v50 }
 0x549   :  { %1242 = vmatpush1.bf16.msra.mxu0 %v2125_v52  ;;  %1283 = vmatpush1.bf16.msra.mxu1 %v2132_v54 }
 0x54a   :  { %1333 = vmatprep.subr.bf16.mxu0 %v2414_v17  ;;  %1374 = vmatprep.subr.bf16.mxu1 %v2417_v18 }
 0x5ff   :  { %v1155_v35 = vpop.f32.mrb[36].mxu0  ;;  %v1196_v37 = vpop.f32.mrb[36].mxu1 }
 0x600   :  { %v1203_v39 = vadd.f32 %v1155_v35, %v2627_v38  ;;  %v1205_v42 = vadd.f32 %v1196_v37, %v2628_v41  ;;  %v1157_v43 = vpop.f32.mrb[37].mxu0  ;;  %v1198_v44 = vpop.f32.mrb[37].mxu1 }
 0x601   :  { %v1204_v47 = vadd.f32 %v1157_v43, %v2629_v45  ;;  %v1206_v49 = vadd.f32 %v1198_v44, %v2630_v48  ;;  %v1159_v50 = vpop.f32.mrb[38].mxu0  ;;  %v1200_v52 = vpop.f32.mrb[38].mxu1 }
 0x602   :  { %1784 = vtanh.f32 %v1203_v39  ;;  %v1160_v54 = vpop.f32.mrb[39].mxu0  ;;  %v1201_v22 = vpop.f32.mrb[39].mxu1 }
 0x603   :  { %1786 = vtanh.f32 %v1204_v47 }
 0x604   :  { %1788 = vtanh.f32 %v1206_v49 }
 0x605   :  { %1790 = vtanh.f32 %v1205_v42 }
 0x60c   :  { %v1785_v17 = vpop.eup %1784 }
 0x60d   :  { %v1211_v18 = vmul.f32 0.5, %v1785_v17  ;;  %v1787_v23 = vpop.eup %1786  ;;  %v1434_v17 = vld [vmem:[%s2591_s6] sm:$0xff] }
 0x60e   :  { %v1212_v26 = vmul.f32 0.5, %v1787_v23  ;;  %v1789_v27 = vpop.eup %1788 }
 0x60f   :  { %v1214_v24 = vadd.f32 0.5, %v1211_v18  ;;  %v1791_v33 = vpop.eup %1790  ;;  %v1435_v18 = vld [vmem:[%s2591_s6 + $0x8] sm:$0xff] }
 0x610   :  { %v1215_v28 = vadd.f32 0.5, %v1212_v26  ;;  %v1213_v34 = vmul.f32 0.5, %v1791_v33  ;;  %v1652_v23 = vpack.c.bf16 %v1435_v18, %v1434_v17  ;;  %v1436_v26 = vld [vmem:[%s2591_s6 + $0x10] sm:$0xff] }
 0x611   :  { %v1218_v30 = vmul.f32 %v1789_v27, %v1214_v24  ;;  %v1903_v24 = vmov 0.0|0.0   ;;  %v1437_v27 = vld [vmem:[%s2591_s6 + $0x18] sm:$0xff]  ;;  %v1440_v33 = vld [vmem:[%s2591_s6 + $0x30] sm:$0xff] }
 0x612   :  { %v1217_v31 = vmul.f32 %v1215_v28, %v2425_v29  ;;  %v1216_v13 = vadd.f32 0.5, %v1213_v34  ;;  %v1840_v29 = vld [vmem:[#allocation5 + $0xc0] ss:$16 sps:$4 sm:$0xff]   ;;  %v1655_v28 = vpack.c.bf16 %v1437_v27, %v1436_v26  ;;  %v1441_v34 = vld [vmem:[%s2591_s6 + $0x38] sm:$0xff] }
 0x614   :  { %v2497_v32 = vadd.f32 %v1218_v30, %v1217_v31  ;;  %v1438_v30 = vld [vmem:[%s2591_s6 + $0x20] sm:$0xff]  ;;  %v1439_v31 = vld [vmem:[%s2591_s6 + $0x28] sm:$0xff] }
 0x616   :  { %1792 = vtanh.f32 %v2497_v32 }
 0x620   :  { %v1793_v3 = vpop.eup %1792 }
 0x621   :  { %v1221_v60 = vmul.f32 %v1793_v3, %v1216_v13  ;;  %v1661_v13 = vpack.c.bf16 %v1441_v34, %v1440_v33  ;;  %v1442_v3 = vld [vmem:[%s2591_s6 + $0x40] sm:$0xff] }
 0x623   :  { %v1226_v61 = vpack.c.bf16 %v1221_v60, %v1221_v60  ;;  %v1443_v60 = vld [vmem:[%s2591_s6 + $0x48] sm:$0xff] }
 0x625   :  { %1260 = vmatmul.mubr.bf16.vlgmr.msra.gmra.mrb[40].mxu0 %v1226_v61  ;;  %1301 = vmatmul.mubr.bf16.vlgmr.msra.gmra.mrb[40].mxu1 %v1226_v61  ;;  %v1664_v61 = vpack.c.bf16 %v1443_v60, %v1442_v3 }
 0x626   :  { %1334 = vmatpush1.bf16.msra.mxu0 %v2428_v14  ;;  %1375 = vmatpush1.bf16.msra.mxu1 %v2431_v36  ;;  %v2631_v36 = vld [vmem:[#allocation21_spill] sm:$0xff] }
 0x627   :  { %1335 = vmatprep.subr.bf16.mxu0 %v2434_v53  ;;  %1376 = vmatprep.subr.bf16.mxu1 %v2437_v7  ;;  %v2632_v7 = vld [vmem:[#allocation23_spill] sm:$0xff] }
 0x628   :  { %1365 = vmatprep.mubr.bf16.mxu0 %v2618_v58  ;;  %1406 = vmatprep.mubr.bf16.mxu1 %v2618_v58  ;;  %v1831_v58 = vld [vmem:[#allocation5 + $0x8c] ss:$16 sps:$4 sm:$0xff]  }
 0x62a   :  { %1336 = vmatpush1.bf16.msra.mxu0 %v2442_v12  ;;  %1377 = vmatpush1.bf16.msra.mxu1 %v2445_v51 }
 0x62b   :  { %1337 = vmatprep.subr.bf16.mxu0 %v2448_v57  ;;  %1378 = vmatprep.subr.bf16.mxu1 %v2451_v25  ;;  %v2633_v25 = vld [vmem:[#allocation22_spill] sm:$0xff] }
 0x62e   :  { %1338 = vmatpush1.bf16.msra.mxu0 %v2454_v40  ;;  %1379 = vmatpush1.bf16.msra.mxu1 %v2457_v56  ;;  %v2634_v56 = vld [vmem:[#allocation24_spill] sm:$0xff] }
 0x62f   :  { %1339 = vmatprep.subr.bf16.mxu0 %v2460_v0  ;;  %1380 = vmatprep.subr.bf16.mxu1 %v2463_v63 }
 0x632   :  { %1340 = vmatpush1.bf16.msra.mxu0 %v2466_v46  ;;  %1381 = vmatpush1.bf16.msra.mxu1 %v2469_v19 }
 0x633   :  { %1341 = vmatprep.subr.bf16.mxu0 %v2472_v20  ;;  %1382 = vmatprep.subr.bf16.mxu1 %v1831_v58  ;;  %v1444_v58 = vld [vmem:[%s2591_s6 + $0x50] sm:$0xff] }
 0x636   :  { %1342 = vmatpush1.bf16.msra.mxu0 %v1832_v5  ;;  %1383 = vmatpush1.bf16.msra.mxu1 %v1833_v1  ;;  %v1445_v5 = vld [vmem:[%s2591_s6 + $0x58] sm:$0xff]  ;;  %v1446_v1 = vld [vmem:[%s2591_s6 + $0x60] sm:$0xff] }
 0x637   :  { %1343 = vmatprep.subr.bf16.mxu0 %v1834_v6  ;;  %1384 = vmatprep.subr.bf16.mxu1 %v1835_v2  ;;  %v1667_v6 = vpack.c.bf16 %v1445_v5, %v1444_v58  ;;  %v1447_v2 = vld [vmem:[%s2591_s6 + $0x68] sm:$0xff] }
 0x63a   :  { %1344 = vmatpush1.bf16.msra.mxu0 %v1836_v8  ;;  %1385 = vmatpush1.bf16.msra.mxu1 %v1837_v4  ;;  %v2635_v8 = vmov 0.0   ;;  %v1670_v4 = vpack.c.bf16 %v1447_v2, %v1446_v1 }
 0x63b   :  { %1345 = vmatprep.subr.bf16.mxu0 %v1838_v11  ;;  %1386 = vmatprep.subr.bf16.mxu1 %v1839_v55  ;;  %v1448_v11 = vld [vmem:[%s2591_s6 + $0x70] sm:$0xff]  ;;  %v1449_v55 = vld [vmem:[%s2591_s6 + $0x78] sm:$0xff] }
 0x63e   :  { %1346 = vmatpush1.bf16.msra.mxu0 %v1840_v29  ;;  %1387 = vmatpush1.bf16.msra.mxu1 %v1841_v62  ;;  %v1673_v29 = vpack.c.bf16 %v1449_v55, %v1448_v11 }
 0x63f   :  { %1347 = vmatprep.subr.bf16.mxu0 %v1842_v10  ;;  %1388 = vmatprep.subr.bf16.mxu1 %v1843_v59  ;;  %v2636_v59 = vld [vmem:[#allocation25_spill] sm:$0xff] }
 0x642   :  { %1348 = vmatpush1.bf16.msra.mxu0 %v1844_v15  ;;  %1389 = vmatpush1.bf16.msra.mxu1 %v1845_v16  ;;  %v2637_v16 = vld [vmem:[#allocation27_spill] sm:$0xff] }
 0x643   :  { %1651 = vmatprep.subr.bf16.mxu0 %v1903_v24 }
 0x6f8   :  { %v1261_v9 = vpop.f32.mrb[40].mxu0  ;;  %v1302_v14 = vpop.f32.mrb[40].mxu1 }
 0x6f9   :  { %v1309_v53 = vadd.f32 %v1261_v9, %v2631_v36  ;;  %v1311_v12 = vadd.f32 %v1302_v14, %v2632_v7  ;;  %v1263_v51 = vpop.f32.mrb[41].mxu0  ;;  %v1304_v57 = vpop.f32.mrb[41].mxu1 }
 0x6fa   :  { %v1310_v40 = vadd.f32 %v1263_v51, %v2633_v25  ;;  %v1312_v0 = vadd.f32 %v1304_v57, %v2634_v56  ;;  %v1265_v63 = vpop.f32.mrb[42].mxu0  ;;  %v1306_v46 = vpop.f32.mrb[42].mxu1 }
 0x6fb   :  { %1794 = vtanh.f32 %v1309_v53  ;;  %v1266_v19 = vpop.f32.mrb[43].mxu0  ;;  %v1307_v20 = vpop.f32.mrb[43].mxu1  ;;  %v2638_v53 = vld [vmem:[#allocation26_spill] sm:$0xff] }
 0x6fc   :  { %1796 = vtanh.f32 %v1310_v40 }
 0x6fd   :  { %1798 = vtanh.f32 %v1312_v0 }
 0x6fe   :  { %1800 = vtanh.f32 %v1311_v12 }
 0x705   :  { %v1795_v35 = vpop.eup %1794 }
 0x706   :  { %v1317_v37 = vmul.f32 0.5, %v1795_v35  ;;  %v1797_v38 = vpop.eup %1796 }
 0x707   :  { %v1318_v41 = vmul.f32 0.5, %v1797_v38  ;;  %v1799_v42 = vpop.eup %1798 }
 0x708   :  { %v1320_v39 = vadd.f32 0.5, %v1317_v37  ;;  %v1801_v48 = vpop.eup %1800 }
 0x709   :  { %v1321_v43 = vadd.f32 0.5, %v1318_v41  ;;  %v1319_v49 = vmul.f32 0.5, %v1801_v48 }
 0x70a   :  { %v1324_v44 = vmul.f32 %v1799_v42, %v1320_v39 }
 0x70b   :  { %v1323_v45 = vmul.f32 %v1321_v43, %v2497_v32  ;;  %v1322_v50 = vadd.f32 0.5, %v1319_v49  ;;  %v1658_v32 = vpack.c.bf16 %v1439_v31, %v1438_v30 }
 0x70d   :  { %v2522_v47 = vadd.f32 %v1324_v44, %v1323_v45  ;;  %v1586_v45 = vld [vmem:[%s2592_s7] ss:$0 sm:$0xff] }
 0x70f   :  { %1802 = vtanh.f32 %v2522_v47 }
 0x719   :  { %v1803_v52 = vpop.eup %1802 }
 0x71a   :  { %v1327_v54 = vmul.f32 %v1803_v52, %v1322_v50 }
 0x71c   :  { %v1332_v22 = vpack.c.bf16 %v1327_v54, %v1327_v54 }
 0x71e   :  { %1366 = vmatmul.mubr.bf16.vlgmr.msra.gmra.mrb[44].mxu0 %v1332_v22  ;;  %1407 = vmatmul.mubr.bf16.vlgmr.msra.gmra.mrb[44].mxu1 %v1332_v22 }
 0x71f   :  { %1653 = vmatpush3.bf16.msra.mxu0 %v1652_v23  ;;  %1636 = vmatprep.mubr.msk.f32.mxu0 %vm1904_vm4, %v2635_v8 }
 0x720   :  { %1654 = vmatprep.subr.bf16.mxu0 %v1903_v24 }
 0x723   :  { %1656 = vmatpush3.bf16.msra.mxu0 %v1655_v28 }
 0x724   :  { %1657 = vmatprep.subr.bf16.mxu0 %v1903_v24 }
 0x727   :  { %1659 = vmatpush3.bf16.msra.mxu0 %v1658_v32 }
 0x728   :  { %1660 = vmatprep.subr.bf16.mxu0 %v1903_v24 }
 0x72b   :  { %1662 = vmatpush3.bf16.msra.mxu0 %v1661_v13 }
 0x72c   :  { %1663 = vmatprep.subr.bf16.mxu0 %v1903_v24 }
 0x72f   :  { %1665 = vmatpush3.bf16.msra.mxu0 %v1664_v61 }
 0x730   :  { %1666 = vmatprep.subr.bf16.mxu0 %v1903_v24 }
 0x733   :  { %1668 = vmatpush3.bf16.msra.mxu0 %v1667_v6 }
 0x734   :  { %1669 = vmatprep.subr.bf16.mxu0 %v1903_v24 }
 0x737   :  { %1671 = vmatpush3.bf16.msra.mxu0 %v1670_v4 }
 0x738   :  { %1672 = vmatprep.subr.bf16.mxu0 %v1903_v24 }
 0x73b   :  { %1674 = vmatpush3.bf16.msra.mxu0 %v1673_v29 }
 0x7f1   :  { %v1367_v62 = vpop.f32.mrb[44].mxu0  ;;  %v1408_v10 = vpop.f32.mrb[44].mxu1 }
 0x7f2   :  { %v1415_v15 = vadd.f32 %v1367_v62, %v2636_v59  ;;  %v1417_v9 = vadd.f32 %v1408_v10, %v2637_v16  ;;  %v1369_v14 = vpop.f32.mrb[45].mxu0  ;;  %v1410_v36 = vpop.f32.mrb[45].mxu1 }
 0x7f3   :  { %v1416_v7 = vadd.f32 %v1369_v14, %v2638_v53  ;;  %v1418_v12 = vadd.f32 %v1410_v36, %v2245_v21  ;;  %v1371_v51 = vpop.f32.mrb[46].mxu0  ;;  %v1412_v57 = vpop.f32.mrb[46].mxu1 }
 0x7f4   :  { %1804 = vtanh.f32 %v1415_v15  ;;  %v1372_v25 = vpop.f32.mrb[47].mxu0  ;;  %v1413_v40 = vpop.f32.mrb[47].mxu1 }
 0x7f5   :  { %1806 = vtanh.f32 %v1416_v7 }
 0x7f6   :  { %1808 = vtanh.f32 %v1418_v12 }
 0x7f7   :  { %1810 = vtanh.f32 %v1417_v9 }
 0x7fe   :  { %v1805_v56 = vpop.eup %1804 }
 0x7ff   :  { %v1423_v0 = vmul.f32 0.5, %v1805_v56  ;;  %v1807_v63 = vpop.eup %1806 }
 0x800   :  { %v1424_v19 = vmul.f32 0.5, %v1807_v63  ;;  %v1809_v20 = vpop.eup %1808 }
 0x801   :  { %v1426_v46 = vadd.f32 0.5, %v1423_v0  ;;  %v1811_v21 = vpop.eup %1810 }
 0x802   :  { %v1427_v35 = vadd.f32 0.5, %v1424_v19  ;;  %v1425_v41 = vmul.f32 0.5, %v1811_v21 }
 0x803   :  { %v1430_v37 = vmul.f32 %v1809_v20, %v1426_v46 }
 0x804   :  { %v1429_v38 = vmul.f32 %v1427_v35, %v2522_v47  ;;  %v1428_v42 = vadd.f32 0.5, %v1425_v41 }
 0x806   :  { %v1431_v39 = vadd.f32 %v1430_v37, %v1429_v38 }
 0x808   :  { %1812 = vtanh.f32 %v1431_v39 }
 0x812   :  { %v1813_v43 = vpop.eup %1812 }
 0x813   :  { %v1433_v44 = vmul.f32 %v1813_v43, %v1428_v42 }
 0x815   :  { %1637 = vmatmul.mubr.f32.vlgmr.msra.gmra.mrb[48].mxu0 %v1433_v44 }
 0x8e8   :  { %v1523_v48 = vpop.f32.mrb[48].mxu0 }
 0x8e9   :  { %v1524_v49 = vadd.f32 %v1586_v45, %v1523_v48  ;;  %v1638_v50 = vpop.f32.mrb[49].mxu0 }
 0x8eb   :  { %1527 = vst [vmem:[%s2593_s8] sm:$0xff] %v1524_v49 }
 0x8ec   :  { %1532 = vsyncpa [#allocation4], 1 }
 0x8ed   :  { %1533 = vsyncpa [#allocation6], 1 }

</bundles_post_ra>
